<compile_context>
chip_gen: v6e
topology: v6e:2x2x1
jax: 0.10.0
libtpu: 0.0.40
codegen_flags: <defaults>
</compile_context>

<pallas_src>
import jax
import jax.numpy as jnp
from jax.experimental import pallas as pl
from jax.experimental.pallas import tpu as pltpu


# ----------------------------- Pallas kernel --------------------------------
def _actor_kernel(xproj_ref,   # (T, TB, 4H)  precomputed x @ W_ih1 + b1 (time-major)
                  whh1_ref,    # (H, 4H)
                  wih2_ref,    # (H, 4H)
                  whh2_ref,    # (H, 4H)
                  b2_ref,      # (1, 4H)
                  wfc_ref,     # (H, A)
                  bfc_ref,     # (1, A)
                  out_ref):    # (T, TB, A)   resident; written back once per tile
    seq_len, bt, _ = xproj_ref.shape
    hidden = whh1_ref.shape[0]
    act_dim = wfc_ref.shape[1]

    # Hoist loop-invariant loads / broadcasts (JAX does not CSE broadcasts).
    w_hh1 = whh1_ref[...]
    w_ih2 = wih2_ref[...]
    w_hh2 = whh2_ref[...]
    w_fc = wfc_ref[...]
    b2 = jnp.broadcast_to(b2_ref[...], (bt, 4 * hidden))
    b_fc = jnp.broadcast_to(bfc_ref[...], (bt, act_dim))

    def gate_update(g, c_prev):
        # NOTE: for the real model (H=1024) these gate slices are 128-lane
        # aligned; only the toy H=32 config produces sub-lane slices.
        H = hidden
        i_g = jax.nn.sigmoid(g[:, 0 * H:1 * H])
        f_g = jax.nn.sigmoid(g[:, 1 * H:2 * H])
        g_g = jnp.tanh(g[:, 2 * H:3 * H])
        o_g = jax.nn.sigmoid(g[:, 3 * H:4 * H])
        c_new = f_g * c_prev + i_g * g_g
        h_new = o_g * jnp.tanh(c_new)
        return h_new, c_new

    def step(t, carry):
        h1, c1, h2, c2 = carry
        # Layer 1: input projection was precomputed -> only the recurrent dot
        # remains on the serial critical path.
        g1 = xproj_ref[t] + jnp.dot(h1, w_hh1, preferred_element_type=jnp.float32)
        h1, c1 = gate_update(g1, c1)
        # Layer 2.
        g2 = (jnp.dot(h1, w_ih2, preferred_element_type=jnp.float32)
              + jnp.dot(h2, w_hh2, preferred_element_type=jnp.float32)
              + b2)
        h2, c2 = gate_update(g2, c2)
        # Head (does not feed the recurrence, so it is off the critical path).
        act = jnp.tanh(jnp.dot(h2, w_fc, preferred_element_type=jnp.float32) + b_fc)
        out_ref[t] = act.astype(out_ref.dtype)
        return h1, c1, h2, c2

    zeros = jnp.zeros((bt, hidden), jnp.float32)     # PyTorch default h0/c0 = 0
    jax.lax.fori_loop(0, seq_len, step, (zeros, zeros, zeros, zeros),
                      unroll=True)


# ------------------------------ wrapper --------------------------------------
def direct_actor_forward(vision_embeded, proprioception, latent, goal_embeded,
                         params):
    """params: dict of transposed weights (see init_params)."""
    # glue: same concatenation order as the PyTorch module
    x = jnp.concatenate([vision_embeded, proprioception, latent, goal_embeded],
                        axis=-1)                                  # (B, T, D)
    B, T, D = x.shape
    H = params["whh1"].shape[0]
    A = params["wfc"].shape[1]

    # (1) Hoist the layer-1 input projection out of the recurrence: one big
    #     MXU-friendly matmul; XLA fuses the concat into it.
    xproj = (x.reshape(B * T, D) @ params["wih1"] + params["b1"])  # (B*T, 4H)
    xproj = xproj.reshape(B, T, 4 * H)
    # time-major so the kernel's per-step read is one contiguous (TB, 4H) slab
    xproj = jnp.transpose(xproj, (1, 0, 2))                        # (T, B, 4H)

    # Batch tile: a multiple of 8 sublanes when possible; >= 2 tiles lets the
    # "parallel" grid axis shard batch elements across TensorCores (v7x).
    if B % 8 == 0 and B >= 16:
        bt = 8
    else:
        bt = B
    n_bt = B // bt

    full = lambda shape: pl.BlockSpec(shape, lambda b: tuple(0 for _ in shape))

    out = pl.pallas_call(
        _actor_kernel,
        out_shape=jax.ShapeDtypeStruct((T, B, A), jnp.float32),
        grid_spec=pltpu.PrefetchScalarGridSpec(
            num_scalar_prefetch=0,
            grid=(n_bt,),
            in_specs=[
                pl.BlockSpec((T, bt, 4 * H), lambda b: (0, b, 0)),  # x_proj
                full((H, 4 * H)),      # whh1
                full((H, 4 * H)),      # wih2
                full((H, 4 * H)),      # whh2
                full((1, 4 * H)),      # b2  (= b_ih2 + b_hh2)
                full((H, A)),          # wfc
                full((1, A)),          # bfc
            ],
            out_specs=pl.BlockSpec((T, bt, A), lambda b: (0, b, 0)),
        ),
        compiler_params=pltpu.CompilerParams(
            # batch tiles are independent -> parallel (time is in-kernel)
            dimension_semantics=("parallel",),
            vmem_limit_bytes=32 * 1024 * 1024,
        ),
    )(xproj,
      params["whh1"], params["wih2"], params["whh2"], params["b2"],
      params["wfc"], params["bfc"])

    return jnp.transpose(out, (1, 0, 2))                           # (B, T, A)


# ------------------------- deterministic parameters --------------------------
def init_params(key, in_dim, hidden, action_dim):
    ks = jax.random.split(key, 10)
    s = 1.0 / jnp.sqrt(hidden)
    u = lambda k, shape: jax.random.uniform(k, shape, jnp.float32, -s, s)
    # stored transposed vs. PyTorch: (in, 4H)
    return dict(
        wih1=u(ks[0], (in_dim, 4 * hidden)),
        whh1=u(ks[1], (hidden, 4 * hidden)),
        b1=u(ks[2], (1, 4 * hidden)) + u(ks[3], (1, 4 * hidden)),  # b_ih + b_hh
        wih2=u(ks[4], (hidden, 4 * hidden)),
        whh2=u(ks[5], (hidden, 4 * hidden)),
        b2=u(ks[6], (1, 4 * hidden)) + u(ks[7], (1, 4 * hidden)),
        wfc=u(ks[8], (hidden, action_dim)),
        bfc=u(ks[9], (1, action_dim)),
    )


# ----------------------------- pure-JAX reference ----------------------------
def _reference(vision, prop, latent, goal, p, hidden):
    x = jnp.concatenate([vision, prop, latent, goal], axis=-1)
    B, T, D = x.shape

    def lstm(seq, wih, whh, b):
        def step(carry, x_t):
            h, c = carry
            g = x_t @ wih + h @ whh + b[0]
            i = jax.nn.sigmoid(g[:, 0 * hidden:1 * hidden])
            f = jax.nn.sigmoid(g[:, 1 * hidden:2 * hidden])
            gg = jnp.tanh(g[:, 2 * hidden:3 * hidden])
            o = jax.nn.sigmoid(g[:, 3 * hidden:4 * hidden])
            c = f * c + i * gg
            h = o * jnp.tanh(c)
            return (h, c), h
        init = (jnp.zeros((B, hidden)), jnp.zeros((B, hidden)))
        _, hs = jax.lax.scan(step, init, jnp.swapaxes(seq, 0, 1))
        return jnp.swapaxes(hs, 0, 1)

    h = lstm(x, p["wih1"], p["whh1"], p["b1"])
    h = lstm(h, p["wih2"], p["whh2"], p["b2"])
    return jnp.tanh(h @ p["wfc"] + p["bfc"][0])


# ----------------------------------- main ------------------------------------
if __name__ == "__main__":
    # small synthetic config (params.* of the original module)
    vision_embedding_dim = 16
    proprioception_dim = 8
    latent_dim = 8
    action_dim = 4
    layer_size = 32          # LSTM hidden size
    in_dim = 2 * vision_embedding_dim + latent_dim + proprioception_dim  # 48

    B, T = 2, 8

    key = jax.random.PRNGKey(0)
    k_v, k_p, k_l, k_g, k_w = jax.random.split(key, 5)
    vision = jax.random.normal(k_v, (B, T, vision_embedding_dim), jnp.float32)
    prop = jax.random.normal(k_p, (B, T, proprioception_dim), jnp.float32)
    latent = jax.random.normal(k_l, (B, T, latent_dim), jnp.float32)
    goal = jax.random.normal(k_g, (B, T, vision_embedding_dim), jnp.float32)

    params = init_params(k_w, in_dim, layer_size, action_dim)

    out = direct_actor_forward(vision, prop, latent, goal, params)
    out = jax.block_until_ready(out)

    ref = _reference(vision, prop, latent, goal, params, layer_size)
    assert out.shape == (B, T, action_dim)
    assert jnp.allclose(out, ref, rtol=1e-4, atol=1e-5), (
        float(jnp.max(jnp.abs(out - ref))))

    print("KERNEL_OK")
</pallas_src>

<mosaic_0001>
module attributes {stable_mosaic.version = 11 : i64} {
  func.func @_actor_kernel(%arg0: i32, %arg1: memref<8x2x128xf32, #tpu.memory_space<vmem>>, %arg2: memref<32x128xf32, #tpu.memory_space<vmem>>, %arg3: memref<32x128xf32, #tpu.memory_space<vmem>>, %arg4: memref<32x128xf32, #tpu.memory_space<vmem>>, %arg5: memref<1x128xf32, #tpu.memory_space<vmem>>, %arg6: memref<32x4xf32, #tpu.memory_space<vmem>>, %arg7: memref<1x4xf32, #tpu.memory_space<vmem>>, %arg8: memref<8x2x4xf32, #tpu.memory_space<vmem>>) attributes {dimension_semantics = [#tpu.dimension_semantics<parallel>], iteration_bounds = array<i64: 1>, scalar_prefetch = 0 : i64, scratch_operands = 0 : i64, tpu.core_type = #tpu.core_type<tc>, window_params = [{transform_indices = @transform_0, window_bounds = array<i64: 8, 2, 128>}, {pipeline_mode = #tpu.pipeline_mode<synchronous>, transform_indices = @transform_1, window_bounds = array<i64: 32, 128>}, {pipeline_mode = #tpu.pipeline_mode<synchronous>, transform_indices = @transform_2, window_bounds = array<i64: 32, 128>}, {pipeline_mode = #tpu.pipeline_mode<synchronous>, transform_indices = @transform_3, window_bounds = array<i64: 32, 128>}, {pipeline_mode = #tpu.pipeline_mode<synchronous>, transform_indices = @transform_4, window_bounds = array<i64: 1, 128>}, {pipeline_mode = #tpu.pipeline_mode<synchronous>, transform_indices = @transform_5, window_bounds = array<i64: 32, 4>}, {pipeline_mode = #tpu.pipeline_mode<synchronous>, transform_indices = @transform_6, window_bounds = array<i64: 1, 4>}, {transform_indices = @transform_7, window_bounds = array<i64: 8, 2, 4>}]} {
    %c0 = arith.constant 0 : index
    %c0_0 = arith.constant 0 : index
    %0 = vector.load %arg2[%c0, %c0_0] : memref<32x128xf32, #tpu.memory_space<vmem>>, vector<32x128xf32>
    %c0_1 = arith.constant 0 : index
    %c0_2 = arith.constant 0 : index
    %1 = vector.load %arg3[%c0_1, %c0_2] : memref<32x128xf32, #tpu.memory_space<vmem>>, vector<32x128xf32>
    %c0_3 = arith.constant 0 : index
    %c0_4 = arith.constant 0 : index
    %2 = vector.load %arg4[%c0_3, %c0_4] : memref<32x128xf32, #tpu.memory_space<vmem>>, vector<32x128xf32>
    %c0_5 = arith.constant 0 : index
    %c0_6 = arith.constant 0 : index
    %3 = vector.load %arg6[%c0_5, %c0_6] : memref<32x4xf32, #tpu.memory_space<vmem>>, vector<32x4xf32>
    %c0_7 = arith.constant 0 : index
    %c0_8 = arith.constant 0 : index
    %4 = vector.load %arg5[%c0_7, %c0_8] : memref<1x128xf32, #tpu.memory_space<vmem>>, vector<1x128xf32>
    %5 = vector.shape_cast %4 : vector<1x128xf32> to vector<1x128xf32>
    %6 = vector.broadcast %5 : vector<1x128xf32> to vector<2x128xf32>
    %c0_9 = arith.constant 0 : index
    %c0_10 = arith.constant 0 : index
    %7 = vector.load %arg7[%c0_9, %c0_10] : memref<1x4xf32, #tpu.memory_space<vmem>>, vector<1x4xf32>
    %8 = vector.shape_cast %7 : vector<1x4xf32> to vector<1x4xf32>
    %9 = vector.broadcast %8 : vector<1x4xf32> to vector<2x4xf32>
    %cst = arith.constant 0.000000e+00 : f32
    %10 = vector.broadcast %cst : f32 to vector<2x32xf32>
    %c0_i32 = arith.constant 0 : i32
    %11 = arith.index_cast %c0_i32 : i32 to index
    %c0_11 = arith.constant 0 : index
    %c0_12 = arith.constant 0 : index
    %12 = vector.load %arg1[%11, %c0_11, %c0_12] : memref<8x2x128xf32, #tpu.memory_space<vmem>>, vector<1x2x128xf32>
    %13 = vector.shape_cast %12 : vector<1x2x128xf32> to vector<2x128xf32>
    %cst_13 = arith.constant dense<0.000000e+00> : vector<2x128xf32>
    %14 = tpu.matmul %10, %0, %cst_13 {dimension_numbers = #tpu.dot_dimension_numbers<[1], [0], [0], [1], [0, 0, 1, 1], [], []>} : vector<2x32xf32>, vector<32x128xf32>, vector<2x128xf32> -> vector<2x128xf32>
    %15 = arith.addf %13, %14 : vector<2x128xf32>
    %16 = vector.extract_strided_slice %15 {offsets = [0, 0], sizes = [2, 32], strides = [1, 1]} : vector<2x128xf32> to vector<2x32xf32>
    %17 = arith.negf %16 : vector<2x32xf32>
    %18 = math.exp %17 : vector<2x32xf32>
    %cst_14 = arith.constant 1.000000e+00 : f32
    %19 = vector.broadcast %cst_14 : f32 to vector<2x32xf32>
    %20 = arith.addf %19, %18 : vector<2x32xf32>
    %21 = arith.divf %19, %20 : vector<2x32xf32>
    %22 = vector.extract_strided_slice %15 {offsets = [0, 32], sizes = [2, 32], strides = [1, 1]} : vector<2x128xf32> to vector<2x32xf32>
    %23 = arith.negf %22 : vector<2x32xf32>
    %24 = math.exp %23 : vector<2x32xf32>
    %cst_15 = arith.constant 1.000000e+00 : f32
    %25 = vector.broadcast %cst_15 : f32 to vector<2x32xf32>
    %26 = arith.addf %25, %24 : vector<2x32xf32>
    %27 = arith.divf %25, %26 : vector<2x32xf32>
    %28 = vector.extract_strided_slice %15 {offsets = [0, 64], sizes = [2, 32], strides = [1, 1]} : vector<2x128xf32> to vector<2x32xf32>
    %29 = math.tanh %28 : vector<2x32xf32>
    %30 = vector.extract_strided_slice %15 {offsets = [0, 96], sizes = [2, 32], strides = [1, 1]} : vector<2x128xf32> to vector<2x32xf32>
    %31 = arith.negf %30 : vector<2x32xf32>
    %32 = math.exp %31 : vector<2x32xf32>
    %cst_16 = arith.constant 1.000000e+00 : f32
    %33 = vector.broadcast %cst_16 : f32 to vector<2x32xf32>
    %34 = arith.addf %33, %32 : vector<2x32xf32>
    %35 = arith.divf %33, %34 : vector<2x32xf32>
    %36 = arith.mulf %27, %10 : vector<2x32xf32>
    %37 = arith.mulf %21, %29 : vector<2x32xf32>
    %38 = arith.addf %36, %37 : vector<2x32xf32>
    %39 = math.tanh %38 : vector<2x32xf32>
    %40 = arith.mulf %35, %39 : vector<2x32xf32>
    %cst_17 = arith.constant dense<0.000000e+00> : vector<2x128xf32>
    %41 = tpu.matmul %40, %1, %cst_17 {dimension_numbers = #tpu.dot_dimension_numbers<[1], [0], [0], [1], [0, 0, 1, 1], [], []>} : vector<2x32xf32>, vector<32x128xf32>, vector<2x128xf32> -> vector<2x128xf32>
    %cst_18 = arith.constant dense<0.000000e+00> : vector<2x128xf32>
    %42 = tpu.matmul %10, %2, %cst_18 {dimension_numbers = #tpu.dot_dimension_numbers<[1], [0], [0], [1], [0, 0, 1, 1], [], []>} : vector<2x32xf32>, vector<32x128xf32>, vector<2x128xf32> -> vector<2x128xf32>
    %43 = arith.addf %41, %42 : vector<2x128xf32>
    %44 = arith.addf %43, %6 : vector<2x128xf32>
    %45 = vector.extract_strided_slice %44 {offsets = [0, 0], sizes = [2, 32], strides = [1, 1]} : vector<2x128xf32> to vector<2x32xf32>
    %46 = arith.negf %45 : vector<2x32xf32>
    %47 = math.exp %46 : vector<2x32xf32>
    %cst_19 = arith.constant 1.000000e+00 : f32
    %48 = vector.broadcast %cst_19 : f32 to vector<2x32xf32>
    %49 = arith.addf %48, %47 : vector<2x32xf32>
    %50 = arith.divf %48, %49 : vector<2x32xf32>
    %51 = vector.extract_strided_slice %44 {offsets = [0, 32], sizes = [2, 32], strides = [1, 1]} : vector<2x128xf32> to vector<2x32xf32>
    %52 = arith.negf %51 : vector<2x32xf32>
    %53 = math.exp %52 : vector<2x32xf32>
    %cst_20 = arith.constant 1.000000e+00 : f32
    %54 = vector.broadcast %cst_20 : f32 to vector<2x32xf32>
    %55 = arith.addf %54, %53 : vector<2x32xf32>
    %56 = arith.divf %54, %55 : vector<2x32xf32>
    %57 = vector.extract_strided_slice %44 {offsets = [0, 64], sizes = [2, 32], strides = [1, 1]} : vector<2x128xf32> to vector<2x32xf32>
    %58 = math.tanh %57 : vector<2x32xf32>
    %59 = vector.extract_strided_slice %44 {offsets = [0, 96], sizes = [2, 32], strides = [1, 1]} : vector<2x128xf32> to vector<2x32xf32>
    %60 = arith.negf %59 : vector<2x32xf32>
    %61 = math.exp %60 : vector<2x32xf32>
    %cst_21 = arith.constant 1.000000e+00 : f32
    %62 = vector.broadcast %cst_21 : f32 to vector<2x32xf32>
    %63 = arith.addf %62, %61 : vector<2x32xf32>
    %64 = arith.divf %62, %63 : vector<2x32xf32>
    %65 = arith.mulf %56, %10 : vector<2x32xf32>
    %66 = arith.mulf %50, %58 : vector<2x32xf32>
    %67 = arith.addf %65, %66 : vector<2x32xf32>
    %68 = math.tanh %67 : vector<2x32xf32>
    %69 = arith.mulf %64, %68 : vector<2x32xf32>
    %cst_22 = arith.constant dense<0.000000e+00> : vector<2x4xf32>
    %70 = tpu.matmul %69, %3, %cst_22 {dimension_numbers = #tpu.dot_dimension_numbers<[1], [0], [0], [1], [0, 0, 1, 1], [], []>} : vector<2x32xf32>, vector<32x4xf32>, vector<2x4xf32> -> vector<2x4xf32>
    %71 = arith.addf %70, %9 : vector<2x4xf32>
    %72 = math.tanh %71 : vector<2x4xf32>
    %73 = arith.index_cast %c0_i32 : i32 to index
    %c0_23 = arith.constant 0 : index
    %c0_24 = arith.constant 0 : index
    %74 = vector.load %arg8[%73, %c0_23, %c0_24] : memref<8x2x4xf32, #tpu.memory_space<vmem>>, vector<1x2x4xf32>
    %75 = vector.shape_cast %74 : vector<1x2x4xf32> to vector<2x4xf32>
    %76 = vector.shape_cast %72 : vector<2x4xf32> to vector<1x2x4xf32>
    tpu.vector_store %arg8[%73, %c0_23, %c0_24], %76 {strides = array<i32>} : memref<8x2x4xf32, #tpu.memory_space<vmem>>, vector<1x2x4xf32>,
    %c1_i32 = arith.constant 1 : i32
    %77 = arith.index_cast %c1_i32 : i32 to index
    %c0_25 = arith.constant 0 : index
    %c0_26 = arith.constant 0 : index
    %78 = vector.load %arg1[%77, %c0_25, %c0_26] : memref<8x2x128xf32, #tpu.memory_space<vmem>>, vector<1x2x128xf32>
    %79 = vector.shape_cast %78 : vector<1x2x128xf32> to vector<2x128xf32>
    %cst_27 = arith.constant dense<0.000000e+00> : vector<2x128xf32>
    %80 = tpu.matmul %40, %0, %cst_27 {dimension_numbers = #tpu.dot_dimension_numbers<[1], [0], [0], [1], [0, 0, 1, 1], [], []>} : vector<2x32xf32>, vector<32x128xf32>, vector<2x128xf32> -> vector<2x128xf32>
    %81 = arith.addf %79, %80 : vector<2x128xf32>
    %82 = vector.extract_strided_slice %81 {offsets = [0, 0], sizes = [2, 32], strides = [1, 1]} : vector<2x128xf32> to vector<2x32xf32>
    %83 = arith.negf %82 : vector<2x32xf32>
    %84 = math.exp %83 : vector<2x32xf32>
    %cst_28 = arith.constant 1.000000e+00 : f32
    %85 = vector.broadcast %cst_28 : f32 to vector<2x32xf32>
    %86 = arith.addf %85, %84 : vector<2x32xf32>
    %87 = arith.divf %85, %86 : vector<2x32xf32>
    %88 = vector.extract_strided_slice %81 {offsets = [0, 32], sizes = [2, 32], strides = [1, 1]} : vector<2x128xf32> to vector<2x32xf32>
    %89 = arith.negf %88 : vector<2x32xf32>
    %90 = math.exp %89 : vector<2x32xf32>
    %cst_29 = arith.constant 1.000000e+00 : f32
    %91 = vector.broadcast %cst_29 : f32 to vector<2x32xf32>
    %92 = arith.addf %91, %90 : vector<2x32xf32>
    %93 = arith.divf %91, %92 : vector<2x32xf32>
    %94 = vector.extract_strided_slice %81 {offsets = [0, 64], sizes = [2, 32], strides = [1, 1]} : vector<2x128xf32> to vector<2x32xf32>
    %95 = math.tanh %94 : vector<2x32xf32>
    %96 = vector.extract_strided_slice %81 {offsets = [0, 96], sizes = [2, 32], strides = [1, 1]} : vector<2x128xf32> to vector<2x32xf32>
    %97 = arith.negf %96 : vector<2x32xf32>
    %98 = math.exp %97 : vector<2x32xf32>
    %cst_30 = arith.constant 1.000000e+00 : f32
    %99 = vector.broadcast %cst_30 : f32 to vector<2x32xf32>
    %100 = arith.addf %99, %98 : vector<2x32xf32>
    %101 = arith.divf %99, %100 : vector<2x32xf32>
    %102 = arith.mulf %93, %38 : vector<2x32xf32>
    %103 = arith.mulf %87, %95 : vector<2x32xf32>
    %104 = arith.addf %102, %103 : vector<2x32xf32>
    %105 = math.tanh %104 : vector<2x32xf32>
    %106 = arith.mulf %101, %105 : vector<2x32xf32>
    %cst_31 = arith.constant dense<0.000000e+00> : vector<2x128xf32>
    %107 = tpu.matmul %106, %1, %cst_31 {dimension_numbers = #tpu.dot_dimension_numbers<[1], [0], [0], [1], [0, 0, 1, 1], [], []>} : vector<2x32xf32>, vector<32x128xf32>, vector<2x128xf32> -> vector<2x128xf32>
    %cst_32 = arith.constant dense<0.000000e+00> : vector<2x128xf32>
    %108 = tpu.matmul %69, %2, %cst_32 {dimension_numbers = #tpu.dot_dimension_numbers<[1], [0], [0], [1], [0, 0, 1, 1], [], []>} : vector<2x32xf32>, vector<32x128xf32>, vector<2x128xf32> -> vector<2x128xf32>
    %109 = arith.addf %107, %108 : vector<2x128xf32>
    %110 = arith.addf %109, %6 : vector<2x128xf32>
    %111 = vector.extract_strided_slice %110 {offsets = [0, 0], sizes = [2, 32], strides = [1, 1]} : vector<2x128xf32> to vector<2x32xf32>
    %112 = arith.negf %111 : vector<2x32xf32>
    %113 = math.exp %112 : vector<2x32xf32>
    %cst_33 = arith.constant 1.000000e+00 : f32
    %114 = vector.broadcast %cst_33 : f32 to vector<2x32xf32>
    %115 = arith.addf %114, %113 : vector<2x32xf32>
    %116 = arith.divf %114, %115 : vector<2x32xf32>
    %117 = vector.extract_strided_slice %110 {offsets = [0, 32], sizes = [2, 32], strides = [1, 1]} : vector<2x128xf32> to vector<2x32xf32>
    %118 = arith.negf %117 : vector<2x32xf32>
    %119 = math.exp %118 : vector<2x32xf32>
    %cst_34 = arith.constant 1.000000e+00 : f32
    %120 = vector.broadcast %cst_34 : f32 to vector<2x32xf32>
    %121 = arith.addf %120, %119 : vector<2x32xf32>
    %122 = arith.divf %120, %121 : vector<2x32xf32>
    %123 = vector.extract_strided_slice %110 {offsets = [0, 64], sizes = [2, 32], strides = [1, 1]} : vector<2x128xf32> to vector<2x32xf32>
    %124 = math.tanh %123 : vector<2x32xf32>
    %125 = vector.extract_strided_slice %110 {offsets = [0, 96], sizes = [2, 32], strides = [1, 1]} : vector<2x128xf32> to vector<2x32xf32>
    %126 = arith.negf %125 : vector<2x32xf32>
    %127 = math.exp %126 : vector<2x32xf32>
    %cst_35 = arith.constant 1.000000e+00 : f32
    %128 = vector.broadcast %cst_35 : f32 to vector<2x32xf32>
    %129 = arith.addf %128, %127 : vector<2x32xf32>
    %130 = arith.divf %128, %129 : vector<2x32xf32>
    %131 = arith.mulf %122, %67 : vector<2x32xf32>
    %132 = arith.mulf %116, %124 : vector<2x32xf32>
    %133 = arith.addf %131, %132 : vector<2x32xf32>
    %134 = math.tanh %133 : vector<2x32xf32>
    %135 = arith.mulf %130, %134 : vector<2x32xf32>
    %cst_36 = arith.constant dense<0.000000e+00> : vector<2x4xf32>
    %136 = tpu.matmul %135, %3, %cst_36 {dimension_numbers = #tpu.dot_dimension_numbers<[1], [0], [0], [1], [0, 0, 1, 1], [], []>} : vector<2x32xf32>, vector<32x4xf32>, vector<2x4xf32> -> vector<2x4xf32>
    %137 = arith.addf %136, %9 : vector<2x4xf32>
    %138 = math.tanh %137 : vector<2x4xf32>
    %139 = arith.index_cast %c1_i32 : i32 to index
    %c0_37 = arith.constant 0 : index
    %c0_38 = arith.constant 0 : index
    %140 = vector.load %arg8[%139, %c0_37, %c0_38] : memref<8x2x4xf32, #tpu.memory_space<vmem>>, vector<1x2x4xf32>
    %141 = vector.shape_cast %140 : vector<1x2x4xf32> to vector<2x4xf32>
    %142 = vector.shape_cast %138 : vector<2x4xf32> to vector<1x2x4xf32>
    tpu.vector_store %arg8[%139, %c0_37, %c0_38], %142 {strides = array<i32>} : memref<8x2x4xf32, #tpu.memory_space<vmem>>, vector<1x2x4xf32>,
    %c2_i32 = arith.constant 2 : i32
    %143 = arith.index_cast %c2_i32 : i32 to index
    %c0_39 = arith.constant 0 : index
    %c0_40 = arith.constant 0 : index
    %144 = vector.load %arg1[%143, %c0_39, %c0_40] : memref<8x2x128xf32, #tpu.memory_space<vmem>>, vector<1x2x128xf32>
    %145 = vector.shape_cast %144 : vector<1x2x128xf32> to vector<2x128xf32>
    %cst_41 = arith.constant dense<0.000000e+00> : vector<2x128xf32>
    %146 = tpu.matmul %106, %0, %cst_41 {dimension_numbers = #tpu.dot_dimension_numbers<[1], [0], [0], [1], [0, 0, 1, 1], [], []>} : vector<2x32xf32>, vector<32x128xf32>, vector<2x128xf32> -> vector<2x128xf32>
    %147 = arith.addf %145, %146 : vector<2x128xf32>
    %148 = vector.extract_strided_slice %147 {offsets = [0, 0], sizes = [2, 32], strides = [1, 1]} : vector<2x128xf32> to vector<2x32xf32>
    %149 = arith.negf %148 : vector<2x32xf32>
    %150 = math.exp %149 : vector<2x32xf32>
    %cst_42 = arith.constant 1.000000e+00 : f32
    %151 = vector.broadcast %cst_42 : f32 to vector<2x32xf32>
    %152 = arith.addf %151, %150 : vector<2x32xf32>
    %153 = arith.divf %151, %152 : vector<2x32xf32>
    %154 = vector.extract_strided_slice %147 {offsets = [0, 32], sizes = [2, 32], strides = [1, 1]} : vector<2x128xf32> to vector<2x32xf32>
    %155 = arith.negf %154 : vector<2x32xf32>
    %156 = math.exp %155 : vector<2x32xf32>
    %cst_43 = arith.constant 1.000000e+00 : f32
    %157 = vector.broadcast %cst_43 : f32 to vector<2x32xf32>
    %158 = arith.addf %157, %156 : vector<2x32xf32>
    %159 = arith.divf %157, %158 : vector<2x32xf32>
    %160 = vector.extract_strided_slice %147 {offsets = [0, 64], sizes = [2, 32], strides = [1, 1]} : vector<2x128xf32> to vector<2x32xf32>
    %161 = math.tanh %160 : vector<2x32xf32>
    %162 = vector.extract_strided_slice %147 {offsets = [0, 96], sizes = [2, 32], strides = [1, 1]} : vector<2x128xf32> to vector<2x32xf32>
    %163 = arith.negf %162 : vector<2x32xf32>
    %164 = math.exp %163 : vector<2x32xf32>
    %cst_44 = arith.constant 1.000000e+00 : f32
    %165 = vector.broadcast %cst_44 : f32 to vector<2x32xf32>
    %166 = arith.addf %165, %164 : vector<2x32xf32>
    %167 = arith.divf %165, %166 : vector<2x32xf32>
    %168 = arith.mulf %159, %104 : vector<2x32xf32>
    %169 = arith.mulf %153, %161 : vector<2x32xf32>
    %170 = arith.addf %168, %169 : vector<2x32xf32>
    %171 = math.tanh %170 : vector<2x32xf32>
    %172 = arith.mulf %167, %171 : vector<2x32xf32>
    %cst_45 = arith.constant dense<0.000000e+00> : vector<2x128xf32>
    %173 = tpu.matmul %172, %1, %cst_45 {dimension_numbers = #tpu.dot_dimension_numbers<[1], [0], [0], [1], [0, 0, 1, 1], [], []>} : vector<2x32xf32>, vector<32x128xf32>, vector<2x128xf32> -> vector<2x128xf32>
    %cst_46 = arith.constant dense<0.000000e+00> : vector<2x128xf32>
    %174 = tpu.matmul %135, %2, %cst_46 {dimension_numbers = #tpu.dot_dimension_numbers<[1], [0], [0], [1], [0, 0, 1, 1], [], []>} : vector<2x32xf32>, vector<32x128xf32>, vector<2x128xf32> -> vector<2x128xf32>
    %175 = arith.addf %173, %174 : vector<2x128xf32>
    %176 = arith.addf %175, %6 : vector<2x128xf32>
    %177 = vector.extract_strided_slice %176 {offsets = [0, 0], sizes = [2, 32], strides = [1, 1]} : vector<2x128xf32> to vector<2x32xf32>
    %178 = arith.negf %177 : vector<2x32xf32>
    %179 = math.exp %178 : vector<2x32xf32>
    %cst_47 = arith.constant 1.000000e+00 : f32
    %180 = vector.broadcast %cst_47 : f32 to vector<2x32xf32>
    %181 = arith.addf %180, %179 : vector<2x32xf32>
    %182 = arith.divf %180, %181 : vector<2x32xf32>
    %183 = vector.extract_strided_slice %176 {offsets = [0, 32], sizes = [2, 32], strides = [1, 1]} : vector<2x128xf32> to vector<2x32xf32>
    %184 = arith.negf %183 : vector<2x32xf32>
    %185 = math.exp %184 : vector<2x32xf32>
    %cst_48 = arith.constant 1.000000e+00 : f32
    %186 = vector.broadcast %cst_48 : f32 to vector<2x32xf32>
    %187 = arith.addf %186, %185 : vector<2x32xf32>
    %188 = arith.divf %186, %187 : vector<2x32xf32>
    %189 = vector.extract_strided_slice %176 {offsets = [0, 64], sizes = [2, 32], strides = [1, 1]} : vector<2x128xf32> to vector<2x32xf32>
    %190 = math.tanh %189 : vector<2x32xf32>
    %191 = vector.extract_strided_slice %176 {offsets = [0, 96], sizes = [2, 32], strides = [1, 1]} : vector<2x128xf32> to vector<2x32xf32>
    %192 = arith.negf %191 : vector<2x32xf32>
    %193 = math.exp %192 : vector<2x32xf32>
    %cst_49 = arith.constant 1.000000e+00 : f32
    %194 = vector.broadcast %cst_49 : f32 to vector<2x32xf32>
    %195 = arith.addf %194, %193 : vector<2x32xf32>
    %196 = arith.divf %194, %195 : vector<2x32xf32>
    %197 = arith.mulf %188, %133 : vector<2x32xf32>
    %198 = arith.mulf %182, %190 : vector<2x32xf32>
    %199 = arith.addf %197, %198 : vector<2x32xf32>
    %200 = math.tanh %199 : vector<2x32xf32>
    %201 = arith.mulf %196, %200 : vector<2x32xf32>
    %cst_50 = arith.constant dense<0.000000e+00> : vector<2x4xf32>
    %202 = tpu.matmul %201, %3, %cst_50 {dimension_numbers = #tpu.dot_dimension_numbers<[1], [0], [0], [1], [0, 0, 1, 1], [], []>} : vector<2x32xf32>, vector<32x4xf32>, vector<2x4xf32> -> vector<2x4xf32>
    %203 = arith.addf %202, %9 : vector<2x4xf32>
    %204 = math.tanh %203 : vector<2x4xf32>
    %205 = arith.index_cast %c2_i32 : i32 to index
    %c0_51 = arith.constant 0 : index
    %c0_52 = arith.constant 0 : index
    %206 = vector.load %arg8[%205, %c0_51, %c0_52] : memref<8x2x4xf32, #tpu.memory_space<vmem>>, vector<1x2x4xf32>
    %207 = vector.shape_cast %206 : vector<1x2x4xf32> to vector<2x4xf32>
    %208 = vector.shape_cast %204 : vector<2x4xf32> to vector<1x2x4xf32>
    tpu.vector_store %arg8[%205, %c0_51, %c0_52], %208 {strides = array<i32>} : memref<8x2x4xf32, #tpu.memory_space<vmem>>, vector<1x2x4xf32>,
    %c3_i32 = arith.constant 3 : i32
    %209 = arith.index_cast %c3_i32 : i32 to index
    %c0_53 = arith.constant 0 : index
    %c0_54 = arith.constant 0 : index
    %210 = vector.load %arg1[%209, %c0_53, %c0_54] : memref<8x2x128xf32, #tpu.memory_space<vmem>>, vector<1x2x128xf32>
    %211 = vector.shape_cast %210 : vector<1x2x128xf32> to vector<2x128xf32>
    %cst_55 = arith.constant dense<0.000000e+00> : vector<2x128xf32>
    %212 = tpu.matmul %172, %0, %cst_55 {dimension_numbers = #tpu.dot_dimension_numbers<[1], [0], [0], [1], [0, 0, 1, 1], [], []>} : vector<2x32xf32>, vector<32x128xf32>, vector<2x128xf32> -> vector<2x128xf32>
    %213 = arith.addf %211, %212 : vector<2x128xf32>
    %214 = vector.extract_strided_slice %213 {offsets = [0, 0], sizes = [2, 32], strides = [1, 1]} : vector<2x128xf32> to vector<2x32xf32>
    %215 = arith.negf %214 : vector<2x32xf32>
    %216 = math.exp %215 : vector<2x32xf32>
    %cst_56 = arith.constant 1.000000e+00 : f32
    %217 = vector.broadcast %cst_56 : f32 to vector<2x32xf32>
    %218 = arith.addf %217, %216 : vector<2x32xf32>
    %219 = arith.divf %217, %218 : vector<2x32xf32>
    %220 = vector.extract_strided_slice %213 {offsets = [0, 32], sizes = [2, 32], strides = [1, 1]} : vector<2x128xf32> to vector<2x32xf32>
    %221 = arith.negf %220 : vector<2x32xf32>
    %222 = math.exp %221 : vector<2x32xf32>
    %cst_57 = arith.constant 1.000000e+00 : f32
    %223 = vector.broadcast %cst_57 : f32 to vector<2x32xf32>
    %224 = arith.addf %223, %222 : vector<2x32xf32>
    %225 = arith.divf %223, %224 : vector<2x32xf32>
    %226 = vector.extract_strided_slice %213 {offsets = [0, 64], sizes = [2, 32], strides = [1, 1]} : vector<2x128xf32> to vector<2x32xf32>
    %227 = math.tanh %226 : vector<2x32xf32>
    %228 = vector.extract_strided_slice %213 {offsets = [0, 96], sizes = [2, 32], strides = [1, 1]} : vector<2x128xf32> to vector<2x32xf32>
    %229 = arith.negf %228 : vector<2x32xf32>
    %230 = math.exp %229 : vector<2x32xf32>
    %cst_58 = arith.constant 1.000000e+00 : f32
    %231 = vector.broadcast %cst_58 : f32 to vector<2x32xf32>
    %232 = arith.addf %231, %230 : vector<2x32xf32>
    %233 = arith.divf %231, %232 : vector<2x32xf32>
    %234 = arith.mulf %225, %170 : vector<2x32xf32>
    %235 = arith.mulf %219, %227 : vector<2x32xf32>
    %236 = arith.addf %234, %235 : vector<2x32xf32>
    %237 = math.tanh %236 : vector<2x32xf32>
    %238 = arith.mulf %233, %237 : vector<2x32xf32>
    %cst_59 = arith.constant dense<0.000000e+00> : vector<2x128xf32>
    %239 = tpu.matmul %238, %1, %cst_59 {dimension_numbers = #tpu.dot_dimension_numbers<[1], [0], [0], [1], [0, 0, 1, 1], [], []>} : vector<2x32xf32>, vector<32x128xf32>, vector<2x128xf32> -> vector<2x128xf32>
    %cst_60 = arith.constant dense<0.000000e+00> : vector<2x128xf32>
    %240 = tpu.matmul %201, %2, %cst_60 {dimension_numbers = #tpu.dot_dimension_numbers<[1], [0], [0], [1], [0, 0, 1, 1], [], []>} : vector<2x32xf32>, vector<32x128xf32>, vector<2x128xf32> -> vector<2x128xf32>
    %241 = arith.addf %239, %240 : vector<2x128xf32>
    %242 = arith.addf %241, %6 : vector<2x128xf32>
    %243 = vector.extract_strided_slice %242 {offsets = [0, 0], sizes = [2, 32], strides = [1, 1]} : vector<2x128xf32> to vector<2x32xf32>
    %244 = arith.negf %243 : vector<2x32xf32>
    %245 = math.exp %244 : vector<2x32xf32>
    %cst_61 = arith.constant 1.000000e+00 : f32
    %246 = vector.broadcast %cst_61 : f32 to vector<2x32xf32>
    %247 = arith.addf %246, %245 : vector<2x32xf32>
    %248 = arith.divf %246, %247 : vector<2x32xf32>
    %249 = vector.extract_strided_slice %242 {offsets = [0, 32], sizes = [2, 32], strides = [1, 1]} : vector<2x128xf32> to vector<2x32xf32>
    %250 = arith.negf %249 : vector<2x32xf32>
    %251 = math.exp %250 : vector<2x32xf32>
    %cst_62 = arith.constant 1.000000e+00 : f32
    %252 = vector.broadcast %cst_62 : f32 to vector<2x32xf32>
    %253 = arith.addf %252, %251 : vector<2x32xf32>
    %254 = arith.divf %252, %253 : vector<2x32xf32>
    %255 = vector.extract_strided_slice %242 {offsets = [0, 64], sizes = [2, 32], strides = [1, 1]} : vector<2x128xf32> to vector<2x32xf32>
    %256 = math.tanh %255 : vector<2x32xf32>
    %257 = vector.extract_strided_slice %242 {offsets = [0, 96], sizes = [2, 32], strides = [1, 1]} : vector<2x128xf32> to vector<2x32xf32>
    %258 = arith.negf %257 : vector<2x32xf32>
    %259 = math.exp %258 : vector<2x32xf32>
    %cst_63 = arith.constant 1.000000e+00 : f32
    %260 = vector.broadcast %cst_63 : f32 to vector<2x32xf32>
    %261 = arith.addf %260, %259 : vector<2x32xf32>
    %262 = arith.divf %260, %261 : vector<2x32xf32>
    %263 = arith.mulf %254, %199 : vector<2x32xf32>
    %264 = arith.mulf %248, %256 : vector<2x32xf32>
    %265 = arith.addf %263, %264 : vector<2x32xf32>
    %266 = math.tanh %265 : vector<2x32xf32>
    %267 = arith.mulf %262, %266 : vector<2x32xf32>
    %cst_64 = arith.constant dense<0.000000e+00> : vector<2x4xf32>
    %268 = tpu.matmul %267, %3, %cst_64 {dimension_numbers = #tpu.dot_dimension_numbers<[1], [0], [0], [1], [0, 0, 1, 1], [], []>} : vector<2x32xf32>, vector<32x4xf32>, vector<2x4xf32> -> vector<2x4xf32>
    %269 = arith.addf %268, %9 : vector<2x4xf32>
    %270 = math.tanh %269 : vector<2x4xf32>
    %271 = arith.index_cast %c3_i32 : i32 to index
    %c0_65 = arith.constant 0 : index
    %c0_66 = arith.constant 0 : index
    %272 = vector.load %arg8[%271, %c0_65, %c0_66] : memref<8x2x4xf32, #tpu.memory_space<vmem>>, vector<1x2x4xf32>
    %273 = vector.shape_cast %272 : vector<1x2x4xf32> to vector<2x4xf32>
    %274 = vector.shape_cast %270 : vector<2x4xf32> to vector<1x2x4xf32>
    tpu.vector_store %arg8[%271, %c0_65, %c0_66], %274 {strides = array<i32>} : memref<8x2x4xf32, #tpu.memory_space<vmem>>, vector<1x2x4xf32>,
    %c4_i32 = arith.constant 4 : i32
    %275 = arith.index_cast %c4_i32 : i32 to index
    %c0_67 = arith.constant 0 : index
    %c0_68 = arith.constant 0 : index
    %276 = vector.load %arg1[%275, %c0_67, %c0_68] : memref<8x2x128xf32, #tpu.memory_space<vmem>>, vector<1x2x128xf32>
    %277 = vector.shape_cast %276 : vector<1x2x128xf32> to vector<2x128xf32>
    %cst_69 = arith.constant dense<0.000000e+00> : vector<2x128xf32>
    %278 = tpu.matmul %238, %0, %cst_69 {dimension_numbers = #tpu.dot_dimension_numbers<[1], [0], [0], [1], [0, 0, 1, 1], [], []>} : vector<2x32xf32>, vector<32x128xf32>, vector<2x128xf32> -> vector<2x128xf32>
    %279 = arith.addf %277, %278 : vector<2x128xf32>
    %280 = vector.extract_strided_slice %279 {offsets = [0, 0], sizes = [2, 32], strides = [1, 1]} : vector<2x128xf32> to vector<2x32xf32>
    %281 = arith.negf %280 : vector<2x32xf32>
    %282 = math.exp %281 : vector<2x32xf32>
    %cst_70 = arith.constant 1.000000e+00 : f32
    %283 = vector.broadcast %cst_70 : f32 to vector<2x32xf32>
    %284 = arith.addf %283, %282 : vector<2x32xf32>
    %285 = arith.divf %283, %284 : vector<2x32xf32>
    %286 = vector.extract_strided_slice %279 {offsets = [0, 32], sizes = [2, 32], strides = [1, 1]} : vector<2x128xf32> to vector<2x32xf32>
    %287 = arith.negf %286 : vector<2x32xf32>
    %288 = math.exp %287 : vector<2x32xf32>
    %cst_71 = arith.constant 1.000000e+00 : f32
    %289 = vector.broadcast %cst_71 : f32 to vector<2x32xf32>
    %290 = arith.addf %289, %288 : vector<2x32xf32>
    %291 = arith.divf %289, %290 : vector<2x32xf32>
    %292 = vector.extract_strided_slice %279 {offsets = [0, 64], sizes = [2, 32], strides = [1, 1]} : vector<2x128xf32> to vector<2x32xf32>
    %293 = math.tanh %292 : vector<2x32xf32>
    %294 = vector.extract_strided_slice %279 {offsets = [0, 96], sizes = [2, 32], strides = [1, 1]} : vector<2x128xf32> to vector<2x32xf32>
    %295 = arith.negf %294 : vector<2x32xf32>
    %296 = math.exp %295 : vector<2x32xf32>
    %cst_72 = arith.constant 1.000000e+00 : f32
    %297 = vector.broadcast %cst_72 : f32 to vector<2x32xf32>
    %298 = arith.addf %297, %296 : vector<2x32xf32>
    %299 = arith.divf %297, %298 : vector<2x32xf32>
    %300 = arith.mulf %291, %236 : vector<2x32xf32>
    %301 = arith.mulf %285, %293 : vector<2x32xf32>
    %302 = arith.addf %300, %301 : vector<2x32xf32>
    %303 = math.tanh %302 : vector<2x32xf32>
    %304 = arith.mulf %299, %303 : vector<2x32xf32>
    %cst_73 = arith.constant dense<0.000000e+00> : vector<2x128xf32>
    %305 = tpu.matmul %304, %1, %cst_73 {dimension_numbers = #tpu.dot_dimension_numbers<[1], [0], [0], [1], [0, 0, 1, 1], [], []>} : vector<2x32xf32>, vector<32x128xf32>, vector<2x128xf32> -> vector<2x128xf32>
    %cst_74 = arith.constant dense<0.000000e+00> : vector<2x128xf32>
    %306 = tpu.matmul %267, %2, %cst_74 {dimension_numbers = #tpu.dot_dimension_numbers<[1], [0], [0], [1], [0, 0, 1, 1], [], []>} : vector<2x32xf32>, vector<32x128xf32>, vector<2x128xf32> -> vector<2x128xf32>
    %307 = arith.addf %305, %306 : vector<2x128xf32>
    %308 = arith.addf %307, %6 : vector<2x128xf32>
    %309 = vector.extract_strided_slice %308 {offsets = [0, 0], sizes = [2, 32], strides = [1, 1]} : vector<2x128xf32> to vector<2x32xf32>
    %310 = arith.negf %309 : vector<2x32xf32>
    %311 = math.exp %310 : vector<2x32xf32>
    %cst_75 = arith.constant 1.000000e+00 : f32
    %312 = vector.broadcast %cst_75 : f32 to vector<2x32xf32>
    %313 = arith.addf %312, %311 : vector<2x32xf32>
    %314 = arith.divf %312, %313 : vector<2x32xf32>
    %315 = vector.extract_strided_slice %308 {offsets = [0, 32], sizes = [2, 32], strides = [1, 1]} : vector<2x128xf32> to vector<2x32xf32>
    %316 = arith.negf %315 : vector<2x32xf32>
    %317 = math.exp %316 : vector<2x32xf32>
    %cst_76 = arith.constant 1.000000e+00 : f32
    %318 = vector.broadcast %cst_76 : f32 to vector<2x32xf32>
    %319 = arith.addf %318, %317 : vector<2x32xf32>
    %320 = arith.divf %318, %319 : vector<2x32xf32>
    %321 = vector.extract_strided_slice %308 {offsets = [0, 64], sizes = [2, 32], strides = [1, 1]} : vector<2x128xf32> to vector<2x32xf32>
    %322 = math.tanh %321 : vector<2x32xf32>
    %323 = vector.extract_strided_slice %308 {offsets = [0, 96], sizes = [2, 32], strides = [1, 1]} : vector<2x128xf32> to vector<2x32xf32>
    %324 = arith.negf %323 : vector<2x32xf32>
    %325 = math.exp %324 : vector<2x32xf32>
    %cst_77 = arith.constant 1.000000e+00 : f32
    %326 = vector.broadcast %cst_77 : f32 to vector<2x32xf32>
    %327 = arith.addf %326, %325 : vector<2x32xf32>
    %328 = arith.divf %326, %327 : vector<2x32xf32>
    %329 = arith.mulf %320, %265 : vector<2x32xf32>
    %330 = arith.mulf %314, %322 : vector<2x32xf32>
    %331 = arith.addf %329, %330 : vector<2x32xf32>
    %332 = math.tanh %331 : vector<2x32xf32>
    %333 = arith.mulf %328, %332 : vector<2x32xf32>
    %cst_78 = arith.constant dense<0.000000e+00> : vector<2x4xf32>
    %334 = tpu.matmul %333, %3, %cst_78 {dimension_numbers = #tpu.dot_dimension_numbers<[1], [0], [0], [1], [0, 0, 1, 1], [], []>} : vector<2x32xf32>, vector<32x4xf32>, vector<2x4xf32> -> vector<2x4xf32>
    %335 = arith.addf %334, %9 : vector<2x4xf32>
    %336 = math.tanh %335 : vector<2x4xf32>
    %337 = arith.index_cast %c4_i32 : i32 to index
    %c0_79 = arith.constant 0 : index
    %c0_80 = arith.constant 0 : index
    %338 = vector.load %arg8[%337, %c0_79, %c0_80] : memref<8x2x4xf32, #tpu.memory_space<vmem>>, vector<1x2x4xf32>
    %339 = vector.shape_cast %338 : vector<1x2x4xf32> to vector<2x4xf32>
    %340 = vector.shape_cast %336 : vector<2x4xf32> to vector<1x2x4xf32>
    tpu.vector_store %arg8[%337, %c0_79, %c0_80], %340 {strides = array<i32>} : memref<8x2x4xf32, #tpu.memory_space<vmem>>, vector<1x2x4xf32>,
    %c5_i32 = arith.constant 5 : i32
    %341 = arith.index_cast %c5_i32 : i32 to index
    %c0_81 = arith.constant 0 : index
    %c0_82 = arith.constant 0 : index
    %342 = vector.load %arg1[%341, %c0_81, %c0_82] : memref<8x2x128xf32, #tpu.memory_space<vmem>>, vector<1x2x128xf32>
    %343 = vector.shape_cast %342 : vector<1x2x128xf32> to vector<2x128xf32>
    %cst_83 = arith.constant dense<0.000000e+00> : vector<2x128xf32>
    %344 = tpu.matmul %304, %0, %cst_83 {dimension_numbers = #tpu.dot_dimension_numbers<[1], [0], [0], [1], [0, 0, 1, 1], [], []>} : vector<2x32xf32>, vector<32x128xf32>, vector<2x128xf32> -> vector<2x128xf32>
    %345 = arith.addf %343, %344 : vector<2x128xf32>
    %346 = vector.extract_strided_slice %345 {offsets = [0, 0], sizes = [2, 32], strides = [1, 1]} : vector<2x128xf32> to vector<2x32xf32>
    %347 = arith.negf %346 : vector<2x32xf32>
    %348 = math.exp %347 : vector<2x32xf32>
    %cst_84 = arith.constant 1.000000e+00 : f32
    %349 = vector.broadcast %cst_84 : f32 to vector<2x32xf32>
    %350 = arith.addf %349, %348 : vector<2x32xf32>
    %351 = arith.divf %349, %350 : vector<2x32xf32>
    %352 = vector.extract_strided_slice %345 {offsets = [0, 32], sizes = [2, 32], strides = [1, 1]} : vector<2x128xf32> to vector<2x32xf32>
    %353 = arith.negf %352 : vector<2x32xf32>
    %354 = math.exp %353 : vector<2x32xf32>
    %cst_85 = arith.constant 1.000000e+00 : f32
    %355 = vector.broadcast %cst_85 : f32 to vector<2x32xf32>
    %356 = arith.addf %355, %354 : vector<2x32xf32>
    %357 = arith.divf %355, %356 : vector<2x32xf32>
    %358 = vector.extract_strided_slice %345 {offsets = [0, 64], sizes = [2, 32], strides = [1, 1]} : vector<2x128xf32> to vector<2x32xf32>
    %359 = math.tanh %358 : vector<2x32xf32>
    %360 = vector.extract_strided_slice %345 {offsets = [0, 96], sizes = [2, 32], strides = [1, 1]} : vector<2x128xf32> to vector<2x32xf32>
    %361 = arith.negf %360 : vector<2x32xf32>
    %362 = math.exp %361 : vector<2x32xf32>
    %cst_86 = arith.constant 1.000000e+00 : f32
    %363 = vector.broadcast %cst_86 : f32 to vector<2x32xf32>
    %364 = arith.addf %363, %362 : vector<2x32xf32>
    %365 = arith.divf %363, %364 : vector<2x32xf32>
    %366 = arith.mulf %357, %302 : vector<2x32xf32>
    %367 = arith.mulf %351, %359 : vector<2x32xf32>
    %368 = arith.addf %366, %367 : vector<2x32xf32>
    %369 = math.tanh %368 : vector<2x32xf32>
    %370 = arith.mulf %365, %369 : vector<2x32xf32>
    %cst_87 = arith.constant dense<0.000000e+00> : vector<2x128xf32>
    %371 = tpu.matmul %370, %1, %cst_87 {dimension_numbers = #tpu.dot_dimension_numbers<[1], [0], [0], [1], [0, 0, 1, 1], [], []>} : vector<2x32xf32>, vector<32x128xf32>, vector<2x128xf32> -> vector<2x128xf32>
    %cst_88 = arith.constant dense<0.000000e+00> : vector<2x128xf32>
    %372 = tpu.matmul %333, %2, %cst_88 {dimension_numbers = #tpu.dot_dimension_numbers<[1], [0], [0], [1], [0, 0, 1, 1], [], []>} : vector<2x32xf32>, vector<32x128xf32>, vector<2x128xf32> -> vector<2x128xf32>
    %373 = arith.addf %371, %372 : vector<2x128xf32>
    %374 = arith.addf %373, %6 : vector<2x128xf32>
    %375 = vector.extract_strided_slice %374 {offsets = [0, 0], sizes = [2, 32], strides = [1, 1]} : vector<2x128xf32> to vector<2x32xf32>
    %376 = arith.negf %375 : vector<2x32xf32>
    %377 = math.exp %376 : vector<2x32xf32>
    %cst_89 = arith.constant 1.000000e+00 : f32
    %378 = vector.broadcast %cst_89 : f32 to vector<2x32xf32>
    %379 = arith.addf %378, %377 : vector<2x32xf32>
    %380 = arith.divf %378, %379 : vector<2x32xf32>
    %381 = vector.extract_strided_slice %374 {offsets = [0, 32], sizes = [2, 32], strides = [1, 1]} : vector<2x128xf32> to vector<2x32xf32>
    %382 = arith.negf %381 : vector<2x32xf32>
    %383 = math.exp %382 : vector<2x32xf32>
    %cst_90 = arith.constant 1.000000e+00 : f32
    %384 = vector.broadcast %cst_90 : f32 to vector<2x32xf32>
    %385 = arith.addf %384, %383 : vector<2x32xf32>
    %386 = arith.divf %384, %385 : vector<2x32xf32>
    %387 = vector.extract_strided_slice %374 {offsets = [0, 64], sizes = [2, 32], strides = [1, 1]} : vector<2x128xf32> to vector<2x32xf32>
    %388 = math.tanh %387 : vector<2x32xf32>
    %389 = vector.extract_strided_slice %374 {offsets = [0, 96], sizes = [2, 32], strides = [1, 1]} : vector<2x128xf32> to vector<2x32xf32>
    %390 = arith.negf %389 : vector<2x32xf32>
    %391 = math.exp %390 : vector<2x32xf32>
    %cst_91 = arith.constant 1.000000e+00 : f32
    %392 = vector.broadcast %cst_91 : f32 to vector<2x32xf32>
    %393 = arith.addf %392, %391 : vector<2x32xf32>
    %394 = arith.divf %392, %393 : vector<2x32xf32>
    %395 = arith.mulf %386, %331 : vector<2x32xf32>
    %396 = arith.mulf %380, %388 : vector<2x32xf32>
    %397 = arith.addf %395, %396 : vector<2x32xf32>
    %398 = math.tanh %397 : vector<2x32xf32>
    %399 = arith.mulf %394, %398 : vector<2x32xf32>
    %cst_92 = arith.constant dense<0.000000e+00> : vector<2x4xf32>
    %400 = tpu.matmul %399, %3, %cst_92 {dimension_numbers = #tpu.dot_dimension_numbers<[1], [0], [0], [1], [0, 0, 1, 1], [], []>} : vector<2x32xf32>, vector<32x4xf32>, vector<2x4xf32> -> vector<2x4xf32>
    %401 = arith.addf %400, %9 : vector<2x4xf32>
    %402 = math.tanh %401 : vector<2x4xf32>
    %403 = arith.index_cast %c5_i32 : i32 to index
    %c0_93 = arith.constant 0 : index
    %c0_94 = arith.constant 0 : index
    %404 = vector.load %arg8[%403, %c0_93, %c0_94] : memref<8x2x4xf32, #tpu.memory_space<vmem>>, vector<1x2x4xf32>
    %405 = vector.shape_cast %404 : vector<1x2x4xf32> to vector<2x4xf32>
    %406 = vector.shape_cast %402 : vector<2x4xf32> to vector<1x2x4xf32>
    tpu.vector_store %arg8[%403, %c0_93, %c0_94], %406 {strides = array<i32>} : memref<8x2x4xf32, #tpu.memory_space<vmem>>, vector<1x2x4xf32>,
    %c6_i32 = arith.constant 6 : i32
    %407 = arith.index_cast %c6_i32 : i32 to index
    %c0_95 = arith.constant 0 : index
    %c0_96 = arith.constant 0 : index
    %408 = vector.load %arg1[%407, %c0_95, %c0_96] : memref<8x2x128xf32, #tpu.memory_space<vmem>>, vector<1x2x128xf32>
    %409 = vector.shape_cast %408 : vector<1x2x128xf32> to vector<2x128xf32>
    %cst_97 = arith.constant dense<0.000000e+00> : vector<2x128xf32>
    %410 = tpu.matmul %370, %0, %cst_97 {dimension_numbers = #tpu.dot_dimension_numbers<[1], [0], [0], [1], [0, 0, 1, 1], [], []>} : vector<2x32xf32>, vector<32x128xf32>, vector<2x128xf32> -> vector<2x128xf32>
    %411 = arith.addf %409, %410 : vector<2x128xf32>
    %412 = vector.extract_strided_slice %411 {offsets = [0, 0], sizes = [2, 32], strides = [1, 1]} : vector<2x128xf32> to vector<2x32xf32>
    %413 = arith.negf %412 : vector<2x32xf32>
    %414 = math.exp %413 : vector<2x32xf32>
    %cst_98 = arith.constant 1.000000e+00 : f32
    %415 = vector.broadcast %cst_98 : f32 to vector<2x32xf32>
    %416 = arith.addf %415, %414 : vector<2x32xf32>
    %417 = arith.divf %415, %416 : vector<2x32xf32>
    %418 = vector.extract_strided_slice %411 {offsets = [0, 32], sizes = [2, 32], strides = [1, 1]} : vector<2x128xf32> to vector<2x32xf32>
    %419 = arith.negf %418 : vector<2x32xf32>
    %420 = math.exp %419 : vector<2x32xf32>
    %cst_99 = arith.constant 1.000000e+00 : f32
    %421 = vector.broadcast %cst_99 : f32 to vector<2x32xf32>
    %422 = arith.addf %421, %420 : vector<2x32xf32>
    %423 = arith.divf %421, %422 : vector<2x32xf32>
    %424 = vector.extract_strided_slice %411 {offsets = [0, 64], sizes = [2, 32], strides = [1, 1]} : vector<2x128xf32> to vector<2x32xf32>
    %425 = math.tanh %424 : vector<2x32xf32>
    %426 = vector.extract_strided_slice %411 {offsets = [0, 96], sizes = [2, 32], strides = [1, 1]} : vector<2x128xf32> to vector<2x32xf32>
    %427 = arith.negf %426 : vector<2x32xf32>
    %428 = math.exp %427 : vector<2x32xf32>
    %cst_100 = arith.constant 1.000000e+00 : f32
    %429 = vector.broadcast %cst_100 : f32 to vector<2x32xf32>
    %430 = arith.addf %429, %428 : vector<2x32xf32>
    %431 = arith.divf %429, %430 : vector<2x32xf32>
    %432 = arith.mulf %423, %368 : vector<2x32xf32>
    %433 = arith.mulf %417, %425 : vector<2x32xf32>
    %434 = arith.addf %432, %433 : vector<2x32xf32>
    %435 = math.tanh %434 : vector<2x32xf32>
    %436 = arith.mulf %431, %435 : vector<2x32xf32>
    %cst_101 = arith.constant dense<0.000000e+00> : vector<2x128xf32>
    %437 = tpu.matmul %436, %1, %cst_101 {dimension_numbers = #tpu.dot_dimension_numbers<[1], [0], [0], [1], [0, 0, 1, 1], [], []>} : vector<2x32xf32>, vector<32x128xf32>, vector<2x128xf32> -> vector<2x128xf32>
    %cst_102 = arith.constant dense<0.000000e+00> : vector<2x128xf32>
    %438 = tpu.matmul %399, %2, %cst_102 {dimension_numbers = #tpu.dot_dimension_numbers<[1], [0], [0], [1], [0, 0, 1, 1], [], []>} : vector<2x32xf32>, vector<32x128xf32>, vector<2x128xf32> -> vector<2x128xf32>
    %439 = arith.addf %437, %438 : vector<2x128xf32>
    %440 = arith.addf %439, %6 : vector<2x128xf32>
    %441 = vector.extract_strided_slice %440 {offsets = [0, 0], sizes = [2, 32], strides = [1, 1]} : vector<2x128xf32> to vector<2x32xf32>
    %442 = arith.negf %441 : vector<2x32xf32>
    %443 = math.exp %442 : vector<2x32xf32>
    %cst_103 = arith.constant 1.000000e+00 : f32
    %444 = vector.broadcast %cst_103 : f32 to vector<2x32xf32>
    %445 = arith.addf %444, %443 : vector<2x32xf32>
    %446 = arith.divf %444, %445 : vector<2x32xf32>
    %447 = vector.extract_strided_slice %440 {offsets = [0, 32], sizes = [2, 32], strides = [1, 1]} : vector<2x128xf32> to vector<2x32xf32>
    %448 = arith.negf %447 : vector<2x32xf32>
    %449 = math.exp %448 : vector<2x32xf32>
    %cst_104 = arith.constant 1.000000e+00 : f32
    %450 = vector.broadcast %cst_104 : f32 to vector<2x32xf32>
    %451 = arith.addf %450, %449 : vector<2x32xf32>
    %452 = arith.divf %450, %451 : vector<2x32xf32>
    %453 = vector.extract_strided_slice %440 {offsets = [0, 64], sizes = [2, 32], strides = [1, 1]} : vector<2x128xf32> to vector<2x32xf32>
    %454 = math.tanh %453 : vector<2x32xf32>
    %455 = vector.extract_strided_slice %440 {offsets = [0, 96], sizes = [2, 32], strides = [1, 1]} : vector<2x128xf32> to vector<2x32xf32>
    %456 = arith.negf %455 : vector<2x32xf32>
    %457 = math.exp %456 : vector<2x32xf32>
    %cst_105 = arith.constant 1.000000e+00 : f32
    %458 = vector.broadcast %cst_105 : f32 to vector<2x32xf32>
    %459 = arith.addf %458, %457 : vector<2x32xf32>
    %460 = arith.divf %458, %459 : vector<2x32xf32>
    %461 = arith.mulf %452, %397 : vector<2x32xf32>
    %462 = arith.mulf %446, %454 : vector<2x32xf32>
    %463 = arith.addf %461, %462 : vector<2x32xf32>
    %464 = math.tanh %463 : vector<2x32xf32>
    %465 = arith.mulf %460, %464 : vector<2x32xf32>
    %cst_106 = arith.constant dense<0.000000e+00> : vector<2x4xf32>
    %466 = tpu.matmul %465, %3, %cst_106 {dimension_numbers = #tpu.dot_dimension_numbers<[1], [0], [0], [1], [0, 0, 1, 1], [], []>} : vector<2x32xf32>, vector<32x4xf32>, vector<2x4xf32> -> vector<2x4xf32>
    %467 = arith.addf %466, %9 : vector<2x4xf32>
    %468 = math.tanh %467 : vector<2x4xf32>
    %469 = arith.index_cast %c6_i32 : i32 to index
    %c0_107 = arith.constant 0 : index
    %c0_108 = arith.constant 0 : index
    %470 = vector.load %arg8[%469, %c0_107, %c0_108] : memref<8x2x4xf32, #tpu.memory_space<vmem>>, vector<1x2x4xf32>
    %471 = vector.shape_cast %470 : vector<1x2x4xf32> to vector<2x4xf32>
    %472 = vector.shape_cast %468 : vector<2x4xf32> to vector<1x2x4xf32>
    tpu.vector_store %arg8[%469, %c0_107, %c0_108], %472 {strides = array<i32>} : memref<8x2x4xf32, #tpu.memory_space<vmem>>, vector<1x2x4xf32>,
    %c7_i32 = arith.constant 7 : i32
    %473 = arith.index_cast %c7_i32 : i32 to index
    %c0_109 = arith.constant 0 : index
    %c0_110 = arith.constant 0 : index
    %474 = vector.load %arg1[%473, %c0_109, %c0_110] : memref<8x2x128xf32, #tpu.memory_space<vmem>>, vector<1x2x128xf32>
    %475 = vector.shape_cast %474 : vector<1x2x128xf32> to vector<2x128xf32>
    %cst_111 = arith.constant dense<0.000000e+00> : vector<2x128xf32>
    %476 = tpu.matmul %436, %0, %cst_111 {dimension_numbers = #tpu.dot_dimension_numbers<[1], [0], [0], [1], [0, 0, 1, 1], [], []>} : vector<2x32xf32>, vector<32x128xf32>, vector<2x128xf32> -> vector<2x128xf32>
    %477 = arith.addf %475, %476 : vector<2x128xf32>
    %478 = vector.extract_strided_slice %477 {offsets = [0, 0], sizes = [2, 32], strides = [1, 1]} : vector<2x128xf32> to vector<2x32xf32>
    %479 = arith.negf %478 : vector<2x32xf32>
    %480 = math.exp %479 : vector<2x32xf32>
    %cst_112 = arith.constant 1.000000e+00 : f32
    %481 = vector.broadcast %cst_112 : f32 to vector<2x32xf32>
    %482 = arith.addf %481, %480 : vector<2x32xf32>
    %483 = arith.divf %481, %482 : vector<2x32xf32>
    %484 = vector.extract_strided_slice %477 {offsets = [0, 32], sizes = [2, 32], strides = [1, 1]} : vector<2x128xf32> to vector<2x32xf32>
    %485 = arith.negf %484 : vector<2x32xf32>
    %486 = math.exp %485 : vector<2x32xf32>
    %cst_113 = arith.constant 1.000000e+00 : f32
    %487 = vector.broadcast %cst_113 : f32 to vector<2x32xf32>
    %488 = arith.addf %487, %486 : vector<2x32xf32>
    %489 = arith.divf %487, %488 : vector<2x32xf32>
    %490 = vector.extract_strided_slice %477 {offsets = [0, 64], sizes = [2, 32], strides = [1, 1]} : vector<2x128xf32> to vector<2x32xf32>
    %491 = math.tanh %490 : vector<2x32xf32>
    %492 = vector.extract_strided_slice %477 {offsets = [0, 96], sizes = [2, 32], strides = [1, 1]} : vector<2x128xf32> to vector<2x32xf32>
    %493 = arith.negf %492 : vector<2x32xf32>
    %494 = math.exp %493 : vector<2x32xf32>
    %cst_114 = arith.constant 1.000000e+00 : f32
    %495 = vector.broadcast %cst_114 : f32 to vector<2x32xf32>
    %496 = arith.addf %495, %494 : vector<2x32xf32>
    %497 = arith.divf %495, %496 : vector<2x32xf32>
    %498 = arith.mulf %489, %434 : vector<2x32xf32>
    %499 = arith.mulf %483, %491 : vector<2x32xf32>
    %500 = arith.addf %498, %499 : vector<2x32xf32>
    %501 = math.tanh %500 : vector<2x32xf32>
    %502 = arith.mulf %497, %501 : vector<2x32xf32>
    %cst_115 = arith.constant dense<0.000000e+00> : vector<2x128xf32>
    %503 = tpu.matmul %502, %1, %cst_115 {dimension_numbers = #tpu.dot_dimension_numbers<[1], [0], [0], [1], [0, 0, 1, 1], [], []>} : vector<2x32xf32>, vector<32x128xf32>, vector<2x128xf32> -> vector<2x128xf32>
    %cst_116 = arith.constant dense<0.000000e+00> : vector<2x128xf32>
    %504 = tpu.matmul %465, %2, %cst_116 {dimension_numbers = #tpu.dot_dimension_numbers<[1], [0], [0], [1], [0, 0, 1, 1], [], []>} : vector<2x32xf32>, vector<32x128xf32>, vector<2x128xf32> -> vector<2x128xf32>
    %505 = arith.addf %503, %504 : vector<2x128xf32>
    %506 = arith.addf %505, %6 : vector<2x128xf32>
    %507 = vector.extract_strided_slice %506 {offsets = [0, 0], sizes = [2, 32], strides = [1, 1]} : vector<2x128xf32> to vector<2x32xf32>
    %508 = arith.negf %507 : vector<2x32xf32>
    %509 = math.exp %508 : vector<2x32xf32>
    %cst_117 = arith.constant 1.000000e+00 : f32
    %510 = vector.broadcast %cst_117 : f32 to vector<2x32xf32>
    %511 = arith.addf %510, %509 : vector<2x32xf32>
    %512 = arith.divf %510, %511 : vector<2x32xf32>
    %513 = vector.extract_strided_slice %506 {offsets = [0, 32], sizes = [2, 32], strides = [1, 1]} : vector<2x128xf32> to vector<2x32xf32>
    %514 = arith.negf %513 : vector<2x32xf32>
    %515 = math.exp %514 : vector<2x32xf32>
    %cst_118 = arith.constant 1.000000e+00 : f32
    %516 = vector.broadcast %cst_118 : f32 to vector<2x32xf32>
    %517 = arith.addf %516, %515 : vector<2x32xf32>
    %518 = arith.divf %516, %517 : vector<2x32xf32>
    %519 = vector.extract_strided_slice %506 {offsets = [0, 64], sizes = [2, 32], strides = [1, 1]} : vector<2x128xf32> to vector<2x32xf32>
    %520 = math.tanh %519 : vector<2x32xf32>
    %521 = vector.extract_strided_slice %506 {offsets = [0, 96], sizes = [2, 32], strides = [1, 1]} : vector<2x128xf32> to vector<2x32xf32>
    %522 = arith.negf %521 : vector<2x32xf32>
    %523 = math.exp %522 : vector<2x32xf32>
    %cst_119 = arith.constant 1.000000e+00 : f32
    %524 = vector.broadcast %cst_119 : f32 to vector<2x32xf32>
    %525 = arith.addf %524, %523 : vector<2x32xf32>
    %526 = arith.divf %524, %525 : vector<2x32xf32>
    %527 = arith.mulf %518, %463 : vector<2x32xf32>
    %528 = arith.mulf %512, %520 : vector<2x32xf32>
    %529 = arith.addf %527, %528 : vector<2x32xf32>
    %530 = math.tanh %529 : vector<2x32xf32>
    %531 = arith.mulf %526, %530 : vector<2x32xf32>
    %cst_120 = arith.constant dense<0.000000e+00> : vector<2x4xf32>
    %532 = tpu.matmul %531, %3, %cst_120 {dimension_numbers = #tpu.dot_dimension_numbers<[1], [0], [0], [1], [0, 0, 1, 1], [], []>} : vector<2x32xf32>, vector<32x4xf32>, vector<2x4xf32> -> vector<2x4xf32>
    %533 = arith.addf %532, %9 : vector<2x4xf32>
    %534 = math.tanh %533 : vector<2x4xf32>
    %535 = arith.index_cast %c7_i32 : i32 to index
    %c0_121 = arith.constant 0 : index
    %c0_122 = arith.constant 0 : index
    %536 = vector.load %arg8[%535, %c0_121, %c0_122] : memref<8x2x4xf32, #tpu.memory_space<vmem>>, vector<1x2x4xf32>
    %537 = vector.shape_cast %536 : vector<1x2x4xf32> to vector<2x4xf32>
    %538 = vector.shape_cast %534 : vector<2x4xf32> to vector<1x2x4xf32>
    tpu.vector_store %arg8[%535, %c0_121, %c0_122], %538 {strides = array<i32>} : memref<8x2x4xf32, #tpu.memory_space<vmem>>, vector<1x2x4xf32>,
    %c8_i32 = arith.constant 8 : i32
    return
  }
  func.func @transform_0(%arg0: i32) -> (i32, i32, i32) {
    %c0_i32 = arith.constant 0 : i32
    %c0_i32_0 = arith.constant 0 : i32
    %c0_i32_1 = arith.constant 0 : i32
    return %c0_i32, %arg0, %c0_i32_0 : i32, i32, i32
  }
  func.func @transform_1(%arg0: i32) -> (i32, i32) {
    %c0_i32 = arith.constant 0 : i32
    %c0_i32_0 = arith.constant 0 : i32
    %c0_i32_1 = arith.constant 0 : i32
    return %c0_i32, %c0_i32_0 : i32, i32
  }
  func.func @transform_2(%arg0: i32) -> (i32, i32) {
    %c0_i32 = arith.constant 0 : i32
    %c0_i32_0 = arith.constant 0 : i32
    %c0_i32_1 = arith.constant 0 : i32
    return %c0_i32, %c0_i32_0 : i32, i32
  }
  func.func @transform_3(%arg0: i32) -> (i32, i32) {
    %c0_i32 = arith.constant 0 : i32
    %c0_i32_0 = arith.constant 0 : i32
    %c0_i32_1 = arith.constant 0 : i32
    return %c0_i32, %c0_i32_0 : i32, i32
  }
  func.func @transform_4(%arg0: i32) -> (i32, i32) {
    %c0_i32 = arith.constant 0 : i32
    %c0_i32_0 = arith.constant 0 : i32
    %c0_i32_1 = arith.constant 0 : i32
    return %c0_i32, %c0_i32_0 : i32, i32
  }
  func.func @transform_5(%arg0: i32) -> (i32, i32) {
    %c0_i32 = arith.constant 0 : i32
    %c0_i32_0 = arith.constant 0 : i32
    %c0_i32_1 = arith.constant 0 : i32
    return %c0_i32, %c0_i32_0 : i32, i32
  }
  func.func @transform_6(%arg0: i32) -> (i32, i32) {
    %c0_i32 = arith.constant 0 : i32
    %c0_i32_0 = arith.constant 0 : i32
    %c0_i32_1 = arith.constant 0 : i32
    return %c0_i32, %c0_i32_0 : i32, i32
  }
  func.func @transform_7(%arg0: i32) -> (i32, i32, i32) {
    %c0_i32 = arith.constant 0 : i32
    %c0_i32_0 = arith.constant 0 : i32
    %c0_i32_1 = arith.constant 0 : i32
    return %c0_i32, %arg0, %c0_i32_0 : i32, i32, i32
  }
}

</mosaic_0001>

<bundles_post_ra>
// kernel: tpu_custom_call.1
= control target key start
LH: loop header
LB: loop body
LE: loop exit
PB: predicated region body
PF: predicated region fallthrough
CT: control target
= control target key end

     0   :  { %12 = vsyncpa [#allocation3], 0  ;;  %s4374_s0 = inlined_call_operand.hbm [shape: f32[8,2,128], index: 0, kind: input, shape index: {}]   ;;  %s4375_s1 = inlined_call_operand.vmem [shape: f32[32,128], index: 1, kind: input, shape index: {}]   ;;  %s4376_s2 = inlined_call_operand.hbm [shape: f32[32,128], index: 2, kind: input, shape index: {}]   ;;  %s4377_s3 = inlined_call_operand.hbm [shape: f32[32,128], index: 3, kind: input, shape index: {}]   ;;  %s4378_s4 = inlined_call_operand.vmem [shape: f32[1,128], index: 4, kind: input, shape index: {}]   ;;  %s4379_s5 = inlined_call_operand.vmem [shape: f32[32,4], index: 5, kind: input, shape index: {}]   ;;  %s4380_s6 = inlined_call_operand.vmem [shape: f32[1,4], index: 6, kind: input, shape index: {}]   ;;  %s4381_s7 = inlined_call_operand.vmem [shape: f32[8,2,4], index: 7, kind: output, shape index: {}]  }
   0x1   :  { %13 = vsyncpa [#allocation5], 0  ;;  %s3669_s24 = smov [#allocation4]  }
   0x2   :  { %s33_s25 = sshll.u32 %s3669_s24, 4  ;;  %s34_s25 = int_to_ptr.vmem [resolvable:$true] %s33_s25 }
   0x3   :  { %s3613_s26 = scalar_lea.vmem %s34_s25, 512  ;;  %p3618_p1 = scmp.lt.s32.totalorder %s34_s25, %s34_s25 }
   0x4   :  { %p3614_p0 = scmp.ne.s32.totalorder %s34_s25, %s3613_s26  ;;  %p3619_p2 = scmp.lt.s32.totalorder %s3613_s26, %s3613_s26 }
   0x6   :  { %p3620_p3 = por %p3619_p2, %p3618_p1 }
   0x8   :  { %p3621_p4 = pnand %p3620_p3, %p3614_p0 }
   0xa   :  { %3624 = shalt.err (!%p3621_p4)
}
   0xb   :  { %s3670_s27 = smov 128   ;;  %s3671_s28 = smov 8  }
   0xc   :  { %39 = dma.hbm_to_vmem [thread:$0]  %s4376_s2, 512, %s34_s25, [#allocation5], %s3670_s27, %s3670_s27, %s3671_s28  }
   0xd   :  { %s3672_s8 = smov [#allocation2]  }
   0xe   :  { %s19_s9 = sshll.u32 %s3672_s8, 4  ;;  %s20_s9 = int_to_ptr.vmem [resolvable:$true] %s19_s9 }
   0xf   :  { %s3633_s10 = scalar_lea.vmem %s20_s9, 256  ;;  %p3638_p6 = scmp.lt.s32.totalorder %s20_s9, %s20_s9 }
  0x10   :  { %p3634_p5 = scmp.ne.s32.totalorder %s20_s9, %s3633_s10  ;;  %p3639_p7 = scmp.lt.s32.totalorder %s3633_s10, %s3633_s10 }
  0x12   :  { %p3640_p8 = por %p3639_p7, %p3638_p6 }
  0x14   :  { %p3641_p9 = pnand %p3640_p8, %p3634_p5 }
  0x16   :  { %3644 = shalt.err (!%p3641_p9)
}
  0x17   :  { %s3673_s11 = smov 32   ;;  %s3674_s12 = smov 2  }
  0x18   :  { %25 = dma.hbm_to_vmem [thread:$0]  %s4374_s0, 256, %s20_s9, [#allocation3], %s3673_s11, %s3673_s11, %s3674_s12  }
  0x19   :  { %s3675_s15 = smov [#allocation6]  }
  0x1a   :  { %s45_s2 = sshll.u32 %s3675_s15, 4  ;;  %s46_s2 = int_to_ptr.vmem [resolvable:$true] %s45_s2 }
  0x1b   :  { %s3653_s16 = scalar_lea.vmem %s46_s2, 512  ;;  %p3658_p11 = scmp.lt.s32.totalorder %s46_s2, %s46_s2 }
  0x1c   :  { %p3654_p10 = scmp.ne.s32.totalorder %s46_s2, %s3653_s16  ;;  %p3659_p12 = scmp.lt.s32.totalorder %s3653_s16, %s3653_s16 }
  0x1e   :  { %p3660_p13 = por %p3659_p12, %p3658_p11 }
  0x20   :  { %p3661_p0 = pnand %p3660_p13, %p3654_p10 }
  0x22   :  { %3664 = shalt.err (!%p3661_p0)
}
  0x23   :  { %51 = dma.hbm_to_vmem [thread:$0]  %s4377_s3, 512, %s46_s2, [#allocation5], %s3670_s27, %s3670_s27, %s3671_s28  }
  0x24   :  { %3665 = dma.done.wait [#allocation3], 256  }
  0x25   :  { %3666 = vsyncadd [#allocation3], 4294967040 }
  0x26   :  { %3667 = dma.done.wait [#allocation5], 1024  }
  0x27   :  { %3668 = vsyncadd [#allocation5], 4294966272  ;;  %v3676_v0 = vmov 0.0   ;;  %vm3677_vm0 = vmmov 0   ;;  %v3739_v1 = vld [vmem:[%s4375_s1 + $0x18] sm:$0xff]  ;;  %v3744_v2 = vld [vmem:[%s4375_s1 + $0x10] sm:$0xff] }
  0x28   :  { %3081 = vmatprep.subr.mxu0 %v3676_v0  ;;  %3089 = vmatprep.mubr.msk.f32.mxu0 %vm3677_vm0, %v3676_v0  ;;  %v3751_v3 = vld [vmem:[%s4375_s1 + $0x8] sm:$0xff]  ;;  %v3758_v4 = vld [vmem:[%s4375_s1] sm:$0xff]  ;;  %s3678_s25 = smov 64   ;;  %v3784_v23 = vld [vmem:[#allocation6 + $0x8] sm:$0xff]  ;;  %vm98_vm1 = vcmask 261120   ;;  %vm443_vm2 = vcmask 25600  }
  0x29   :  { %3092 = vmatprep.subr.mxu1 %v3676_v0  ;;  %3100 = vmatprep.mubr.msk.f32.mxu1 %vm3677_vm0, %v3676_v0  ;;  %v97_v5 = vld [vmem:[#allocation2] sm:$0x3]  ;;  %v3772_v19 = vld [vmem:[#allocation6 + $0x18] sm:$0xff]  ;;  %v3786_v24 = vld [vmem:[#allocation4 + $0x8] sm:$0xff] }
  0x2a   :  { %3082 = vmatpush3.msra.mxu0 %v3739_v1  ;;  %v3774_v20 = vld [vmem:[#allocation4 + $0x18] sm:$0xff]  ;;  %v3776_v21 = vld [vmem:[#allocation6 + $0x10] sm:$0xff]  ;;  %3093 = vmatpush3.msra.mxu1 %v3772_v19  ;;  %v3792_v25 = vld [vmem:[#allocation6] sm:$0xff] }
  0x2b   :  { %3083 = vmatprep.subr.mxu0 %v3676_v0  ;;  %v3780_v22 = vld [vmem:[#allocation4 + $0x10] sm:$0xff]  ;;  %3094 = vmatprep.subr.mxu1 %v3676_v0  ;;  %v3794_v26 = vld [vmem:[#allocation4] sm:$0xff]  ;;  %v3851_v62 = vld [vmem:[%s4379_s5 + $0x18] sm:$0xff] }
  0x2c   :  { %3084 = vmatpush3.msra.mxu0 %v3744_v2  ;;  %3095 = vmatpush3.msra.mxu1 %v3776_v21  ;;  %v3834_v33 = vld [vmem:[%s4378_s4] ss:$0 sm:$0xff]  ;;  %v446_v38 = vld [vmem:[#allocation2 + $0x2] sm:$0x3]  ;;  %v3856_v63 = vld [vmem:[%s4379_s5 + $0x10] sm:$0xff] }
  0x2d   :  { %3085 = vmatprep.subr.mxu0 %v3676_v0  ;;  %3096 = vmatprep.subr.mxu1 %v3676_v0 }
  0x2e   :  { %3086 = vmatpush3.msra.mxu0 %v3751_v3  ;;  %3097 = vmatpush3.msra.mxu1 %v3784_v23 }
  0x2f   :  { %3087 = vmatprep.subr.mxu0 %v3676_v0  ;;  %3098 = vmatprep.subr.mxu1 %v3676_v0 }
  0x30   :  { %3088 = vmatpush3.msra.mxu0 %v3758_v4  ;;  %3099 = vmatpush3.msra.mxu1 %v3792_v25 }
  0x31   :  { %3090 = vmatmul.mubr.f32.vlgmr.msra.gmra.mxu0 %v3676_v0  ;;  %3103 = vmatprep.subr.mxu0 %v3676_v0 }
  0x32   :  { %3111 = vmatprep.mubr.msk.f32.mxu0 %vm3677_vm0, %v3676_v0  ;;  %3104 = vmatpush3.msra.mxu0 %v3774_v20 }
  0x33   :  { %3105 = vmatprep.subr.mxu0 %v3676_v0  ;;  %3101 = vmatmul.mubr.f32.vlgmr.msra.gmra.mxu1 %v3676_v0 }
  0x34   :  { %3106 = vmatpush3.msra.mxu0 %v3780_v22  ;;  %3114 = vmatprep.subr.mxu1 %v3676_v0 }
  0x35   :  { %3107 = vmatprep.subr.mxu0 %v3676_v0  ;;  %3122 = vmatprep.mubr.msk.f32.mxu1 %vm3677_vm0, %v3676_v0 }
  0x36   :  { %3108 = vmatpush3.msra.mxu0 %v3786_v24  ;;  %3115 = vmatpush3.msra.mxu1 %v3851_v62 }
  0x37   :  { %3109 = vmatprep.subr.mxu0 %v3676_v0  ;;  %3116 = vmatprep.subr.mxu1 %v3676_v0 }
  0x38   :  { %3110 = vmatpush3.msra.mxu0 %v3794_v26  ;;  %3117 = vmatpush3.msra.mxu1 %v3856_v63 }
  0x39   :  { %3125 = vmatprep.subr.mxu0 %v3676_v0  ;;  %3118 = vmatprep.subr.mxu1 %v3676_v0 }
  0xf1   :  { %v168_v6 = vpop.f32.mrf.mxu0 }
  0xf2   :  { %v172_v7 = vadd.f32 %v168_v6, %v97_v5  ;;  %v3863_v5 = vld [vmem:[%s4379_s5 + $0x8] sm:$0xff] }
  0xf3   :  { %v3091_v8 = vpop.f32.mrf.mxu0  ;;  %v263_v30 = vpop.f32.mrf.mxu1  ;;  %3119 = vmatpush3.msra.mxu1 %v3863_v5 }
  0xf4   :  { %3443 = vtanh.f32 %v172_v7  ;;  %v2868_v10 = vmul.f32 -1.442695, %v172_v7  ;;  %v3870_v7 = vld [vmem:[%s4379_s5] sm:$0xff]  ;;  %3120 = vmatprep.subr.mxu1 %v3676_v0 }
  0xf5   :  { %v3102_v31 = vpop.f32.mrf.mxu1  ;;  %3121 = vmatpush3.msra.mxu1 %v3870_v7 }
  0xf6   :  { %3445 = vpow2.f32 %v2868_v10  ;;  %3136 = vmatprep.subr.mxu1 %v3676_v0 }
 0x101   :  { %v3444_v9 = vpop.eup %3443 }
 0x102   :  { %182 = vrot.lane.b32.xlu0 %v3444_v9, %s3678_s25 }
 0x103   :  { %v3446_v11 = vpop.eup %3445 }
 0x104   :  { %v176_v12 = vadd.f32 1.0, %v3446_v11 }
 0x106   :  { %3447 = vrcp.f32 %v176_v12 }
 0x113   :  { %v3448_v13 = vpop.eup %3447 }
 0x114   :  { %v180_v16 = vmul.f32 0.0, %v3448_v13 }
 0x174   :  { %v183_v14 = vpop.permute.xlu0 %182 }
 0x175   :  { %v185_v15 = vmul.f32 %v3448_v13, %v183_v14 }
 0x177   :  { %187 = vrot.lane.b32.xlu0 %v185_v15, %s3673_s11  ;;  %v3927_v15 = vld [vmem:[%s4380_s6] ss:$0 sm:$0xff] }
 0x1e9   :  { %v188_v17 = vpop.permute.xlu0 %187 }
 0x1ea   :  { %v3769_v18 = vadd.f32 %v188_v17, %v180_v16 }
 0x1ec   :  { %3449 = vtanh.f32 %v3769_v18 }
 0x1f9   :  { %v3450_v27 = vpop.eup %3449 }
 0x1fa   :  { %193 = vrot.lane.b32.xlu1 %v3450_v27, %s3678_s25 }
 0x26c   :  { %v194_v28 = vpop.permute.xlu1 %193 }
 0x26d   :  { %v196_v29 = vmul.f32 %v3448_v13, %v194_v28 }
 0x26f   :  { %268 = vrot.lane.b32.xlu1 %v196_v29, %s3673_s11 }
 0x2e1   :  { %v269_v32 = vpop.permute.xlu1 %268 }
 0x2e2   :  { %3112 = vmatmul.mubr.msk.f32.vlgmr.msra.gmra.mxu0 %vm98_vm1, %v269_v32 }
 0x2e3   :  { %3126 = vmatpush3.msra.mxu0 %v3739_v1  ;;  %3133 = vmatprep.mubr.msk.f32.mxu0 %vm3677_vm0, %v3676_v0 }
 0x2e4   :  { %3127 = vmatprep.subr.mxu0 %v3676_v0 }
 0x2e5   :  { %3128 = vmatpush3.msra.mxu0 %v3744_v2 }
 0x2e6   :  { %3129 = vmatprep.subr.mxu0 %v3676_v0 }
 0x2e7   :  { %3130 = vmatpush3.msra.mxu0 %v3751_v3 }
 0x2e8   :  { %3131 = vmatprep.subr.mxu0 %v3676_v0 }
 0x2e9   :  { %3132 = vmatpush3.msra.mxu0 %v3758_v4 }
 0x2ea   :  { %3134 = vmatmul.mubr.msk.f32.vlgmr.msra.gmra.mxu0 %vm98_vm1, %v269_v32  ;;  %3147 = vmatprep.subr.mxu0 %v3676_v0 }
 0x2eb   :  { %3148 = vmatpush3.msra.mxu0 %v3774_v20  ;;  %3155 = vmatprep.mubr.msk.f32.mxu0 %vm3677_vm0, %v3676_v0 }
 0x2ec   :  { %3149 = vmatprep.subr.mxu0 %v3676_v0 }
 0x2ed   :  { %3150 = vmatpush3.msra.mxu0 %v3780_v22 }
 0x2ee   :  { %3151 = vmatprep.subr.mxu0 %v3676_v0 }
 0x2ef   :  { %3152 = vmatpush3.msra.mxu0 %v3786_v24 }
 0x2f0   :  { %3153 = vmatprep.subr.mxu0 %v3676_v0 }
 0x2f1   :  { %3154 = vmatpush3.msra.mxu0 %v3794_v26 }
 0x2f2   :  { %3169 = vmatprep.subr.mxu0 %v3676_v0 }
 0x3a2   :  { %v338_v34 = vpop.f32.mrf.mxu0 }
 0x3a3   :  { %v339_v35 = vadd.f32 %v338_v34, %v263_v30  ;;  %v791_v34 = vld [vmem:[#allocation2 + $0x4] sm:$0x3] }
 0x3a4   :  { %v3113_v36 = vpop.f32.mrf.mxu0 }
 0x3a5   :  { %v342_v37 = vadd.f32 %v3834_v33, %v339_v35 }
 0x3a7   :  { %3451 = vtanh.f32 %v342_v37  ;;  %v2870_v44 = vmul.f32 -1.442695, %v342_v37 }
 0x3aa   :  { %v513_v39 = vpop.f32.mrf.mxu0 }
 0x3ab   :  { %v517_v40 = vadd.f32 %v513_v39, %v446_v38 }
 0x3ac   :  { %v3135_v41 = vpop.f32.mrf.mxu0 }
 0x3ad   :  { %3453 = vtanh.f32 %v517_v40  ;;  %v2873_v45 = vmul.f32 -1.442695, %v517_v40 }
 0x3ae   :  { %3455 = vpow2.f32 %v2870_v44 }
 0x3af   :  { %3457 = vpow2.f32 %v2873_v45 }
 0x3b4   :  { %v3452_v42 = vpop.eup %3451 }
 0x3b5   :  { %352 = vrot.lane.b32.xlu0 %v3452_v42, %s3678_s25 }
 0x3ba   :  { %v3454_v43 = vpop.eup %3453 }
 0x3bb   :  { %527 = vrot.lane.b32.xlu1 %v3454_v43, %s3678_s25  ;;  %v3456_v46 = vpop.eup %3455 }
 0x3bc   :  { %v346_v47 = vadd.f32 1.0, %v3456_v46  ;;  %v3458_v48 = vpop.eup %3457 }
 0x3bd   :  { %v521_v49 = vadd.f32 1.0, %v3458_v48 }
 0x3be   :  { %3459 = vrcp.f32 %v346_v47 }
 0x3bf   :  { %3461 = vrcp.f32 %v521_v49 }
 0x3cb   :  { %v3460_v50 = vpop.eup %3459 }
 0x3cc   :  { %v3462_v53 = vpop.eup %3461  ;;  %v350_v56 = vmul.f32 0.0, %v3460_v50 }
 0x3cd   :  { %v525_v59 = vmul.f32 %v3462_v53, %v3769_v18 }
 0x427   :  { %v353_v51 = vpop.permute.xlu0 %352 }
 0x428   :  { %v355_v52 = vmul.f32 %v3460_v50, %v353_v51 }
 0x42a   :  { %357 = vrot.lane.b32.xlu0 %v355_v52, %s3673_s11 }
 0x42d   :  { %v528_v54 = vpop.permute.xlu1 %527 }
 0x42e   :  { %v530_v55 = vmul.f32 %v3462_v53, %v528_v54 }
 0x430   :  { %532 = vrot.lane.b32.xlu1 %v530_v55, %s3673_s11 }
 0x49c   :  { %v358_v57 = vpop.permute.xlu0 %357 }
 0x49d   :  { %v3841_v58 = vadd.f32 %v358_v57, %v350_v56 }
 0x49f   :  { %3463 = vtanh.f32 %v3841_v58 }
 0x4a2   :  { %v533_v60 = vpop.permute.xlu1 %532 }
 0x4a3   :  { %v3845_v61 = vadd.f32 %v533_v60, %v525_v59 }
 0x4a5   :  { %3465 = vtanh.f32 %v3845_v61 }
 0x4ac   :  { %v3464_v6 = vpop.eup %3463 }
 0x4ad   :  { %363 = vrot.lane.b32.xlu0 %v3464_v6, %s3678_s25 }
 0x4b2   :  { %v3466_v8 = vpop.eup %3465 }
 0x4b3   :  { %538 = vrot.lane.b32.xlu1 %v3466_v8, %s3678_s25 }
 0x51f   :  { %v364_v9 = vpop.permute.xlu0 %363 }
 0x520   :  { %v366_v10 = vmul.f32 %v3460_v50, %v364_v9 }
 0x522   :  { %368 = vrot.lane.b32.xlu0 %v366_v10, %s3673_s11 }
 0x525   :  { %v539_v11 = vpop.permute.xlu1 %538 }
 0x526   :  { %v541_v12 = vmul.f32 %v3462_v53, %v539_v11 }
 0x528   :  { %613 = vrot.lane.b32.xlu1 %v541_v12, %s3673_s11 }
 0x594   :  { %v369_v13 = vpop.permute.xlu0 %368 }
 0x595   :  { %3123 = vmatmul.mubr.msk.f32.vlgmr.msra.gmra.mxu1 %vm98_vm1, %v369_v13 }
 0x596   :  { %3137 = vmatpush3.msra.mxu1 %v3772_v19  ;;  %3144 = vmatprep.mubr.msk.f32.mxu1 %vm3677_vm0, %v3676_v0 }
 0x597   :  { %3138 = vmatprep.subr.mxu1 %v3676_v0 }
 0x598   :  { %3139 = vmatpush3.msra.mxu1 %v3776_v21 }
 0x599   :  { %3140 = vmatprep.subr.mxu1 %v3676_v0 }
 0x59a   :  { %3141 = vmatpush3.msra.mxu1 %v3784_v23  ;;  %v614_v14 = vpop.permute.xlu1 %613 }
 0x59b   :  { %3142 = vmatprep.subr.mxu1 %v3676_v0  ;;  %3156 = vmatmul.mubr.msk.f32.vlgmr.msra.gmra.mxu0 %vm98_vm1, %v614_v14 }
 0x59c   :  { %3170 = vmatpush3.msra.mxu0 %v3739_v1  ;;  %3143 = vmatpush3.msra.mxu1 %v3792_v25 }
 0x59d   :  { %3171 = vmatprep.subr.mxu0 %v3676_v0  ;;  %3145 = vmatmul.mubr.msk.f32.vlgmr.msra.gmra.mxu1 %vm98_vm1, %v369_v13 }
 0x59e   :  { %3172 = vmatpush3.msra.mxu0 %v3744_v2  ;;  %3177 = vmatprep.mubr.msk.f32.mxu0 %vm3677_vm0, %v3676_v0 }
 0x59f   :  { %3173 = vmatprep.subr.mxu0 %v3676_v0  ;;  %3158 = vmatprep.subr.mxu1 %v3676_v0 }
 0x5a0   :  { %3174 = vmatpush3.msra.mxu0 %v3751_v3  ;;  %3159 = vmatpush3.msra.mxu1 %v3851_v62 }
 0x5a1   :  { %3175 = vmatprep.subr.mxu0 %v3676_v0  ;;  %3160 = vmatprep.subr.mxu1 %v3676_v0 }
 0x5a2   :  { %3176 = vmatpush3.msra.mxu0 %v3758_v4  ;;  %3161 = vmatpush3.msra.mxu1 %v3856_v63 }
 0x5a3   :  { %3178 = vmatmul.mubr.msk.f32.vlgmr.msra.gmra.mxu0 %vm98_vm1, %v614_v14  ;;  %3191 = vmatprep.subr.mxu0 %v3676_v0 }
 0x5a4   :  { %3162 = vmatprep.subr.mxu1 %v3676_v0  ;;  %3192 = vmatpush3.msra.mxu0 %v3774_v20 }
 0x5a5   :  { %3163 = vmatpush3.msra.mxu1 %v3863_v5  ;;  %3193 = vmatprep.subr.mxu0 %v3676_v0 }
 0x5a6   :  { %3164 = vmatprep.subr.mxu1 %v3676_v0  ;;  %3194 = vmatpush3.msra.mxu0 %v3780_v22 }
 0x5a7   :  { %3165 = vmatpush3.msra.mxu1 %v3870_v7  ;;  %3195 = vmatprep.subr.mxu0 %v3676_v0 }
 0x5a8   :  { %3166 = vmatprep.mubr.msk.f32.mxu1 %vm3677_vm0, %v3676_v0  ;;  %3180 = vmatprep.subr.mxu1 %v3676_v0 }
 0x5a9   :  { %3196 = vmatpush3.msra.mxu0 %v3786_v24  ;;  %3199 = vmatprep.mubr.msk.f32.mxu0 %vm3677_vm0, %v3676_v0 }
 0x5aa   :  { %3197 = vmatprep.subr.mxu0 %v3676_v0 }
 0x5ab   :  { %3198 = vmatpush3.msra.mxu0 %v3794_v26 }
 0x5ac   :  { %3213 = vmatprep.subr.mxu0 %v3676_v0 }
 0x655   :  { %v438_v16 = vpop.f32.mrf.mxu1 }
 0x656   :  { %v439_v17 = vadd.f32 %v3927_v15, %v438_v16 }
 0x657   :  { %v3124_v18 = vpop.f32.mrf.mxu1 }
 0x658   :  { %3467 = vtanh.f32 %v439_v17 }
 0x65b   :  { %v683_v27 = vpop.f32.mrf.mxu0 }
 0x65d   :  { %v608_v28 = vpop.f32.mrf.mxu1  ;;  %v3157_v29 = vpop.f32.mrf.mxu0 }
 0x65e   :  { %v684_v30 = vadd.f32 %v683_v27, %v608_v28  ;;  %v1136_v29 = vld [vmem:[#allocation2 + $0x6] sm:$0x3] }
 0x65f   :  { %v3146_v31 = vpop.f32.mrf.mxu1 }
 0x660   :  { %v687_v32 = vadd.f32 %v3834_v33, %v684_v30 }
 0x662   :  { %3469 = vtanh.f32 %v687_v32  ;;  %v2876_v41 = vmul.f32 -1.442695, %v687_v32 }
 0x663   :  { %v858_v35 = vpop.f32.mrf.mxu0 }
 0x664   :  { %v862_v36 = vadd.f32 %v858_v35, %v791_v34 }
 0x665   :  { %v3468_v37 = vpop.eup %3467  ;;  %v3179_v38 = vpop.f32.mrf.mxu0 }
 0x666   :  { %444 = vst.msk [vmem:[%s4381_s7] sm:$0x3] %vm443_vm2, %v3468_v37  ;;  %3471 = vtanh.f32 %v862_v36  ;;  %v2880_v42 = vmul.f32 -1.442695, %v862_v36 }
 0x667   :  { %3473 = vpow2.f32 %v2876_v41 }
 0x668   :  { %3475 = vpow2.f32 %v2880_v42 }
 0x66f   :  { %v3470_v39 = vpop.eup %3469 }
 0x670   :  { %697 = vrot.lane.b32.xlu0 %v3470_v39, %s3678_s25 }
 0x673   :  { %v3472_v40 = vpop.eup %3471 }
 0x674   :  { %872 = vrot.lane.b32.xlu1 %v3472_v40, %s3678_s25  ;;  %v3474_v43 = vpop.eup %3473 }
 0x675   :  { %v691_v44 = vadd.f32 1.0, %v3474_v43  ;;  %v3476_v45 = vpop.eup %3475 }
 0x676   :  { %v866_v46 = vadd.f32 1.0, %v3476_v45 }
 0x677   :  { %3477 = vrcp.f32 %v691_v44 }
 0x678   :  { %3479 = vrcp.f32 %v866_v46 }
 0x684   :  { %v3478_v47 = vpop.eup %3477 }
 0x685   :  { %v3480_v50 = vpop.eup %3479  ;;  %v695_v53 = vmul.f32 %v3478_v47, %v3841_v58 }
 0x686   :  { %v870_v56 = vmul.f32 %v3480_v50, %v3845_v61 }
 0x6e2   :  { %v698_v48 = vpop.permute.xlu0 %697 }
 0x6e3   :  { %v700_v49 = vmul.f32 %v3478_v47, %v698_v48 }
 0x6e5   :  { %702 = vrot.lane.b32.xlu0 %v700_v49, %s3673_s11 }
 0x6e6   :  { %v873_v51 = vpop.permute.xlu1 %872 }
 0x6e7   :  { %v875_v52 = vmul.f32 %v3480_v50, %v873_v51 }
 0x6e9   :  { %877 = vrot.lane.b32.xlu1 %v875_v52, %s3673_s11 }
 0x757   :  { %v703_v54 = vpop.permute.xlu0 %702 }
 0x758   :  { %v3940_v55 = vadd.f32 %v703_v54, %v695_v53 }
 0x75a   :  { %3481 = vtanh.f32 %v3940_v55 }
 0x75b   :  { %v878_v57 = vpop.permute.xlu1 %877 }
 0x75c   :  { %v3944_v59 = vadd.f32 %v878_v57, %v870_v56 }
 0x75e   :  { %3483 = vtanh.f32 %v3944_v59 }
 0x767   :  { %v3482_v60 = vpop.eup %3481 }
 0x768   :  { %708 = vrot.lane.b32.xlu0 %v3482_v60, %s3678_s25 }
 0x76b   :  { %v3484_v6 = vpop.eup %3483 }
 0x76c   :  { %883 = vrot.lane.b32.xlu1 %v3484_v6, %s3678_s25 }
 0x7da   :  { %v709_v8 = vpop.permute.xlu0 %708 }
 0x7db   :  { %v711_v58 = vmul.f32 %v3478_v47, %v709_v8 }
 0x7dd   :  { %713 = vrot.lane.b32.xlu0 %v711_v58, %s3673_s11 }
 0x7de   :  { %v884_v9 = vpop.permute.xlu1 %883 }
 0x7df   :  { %v886_v10 = vmul.f32 %v3480_v50, %v884_v9 }
 0x7e1   :  { %958 = vrot.lane.b32.xlu1 %v886_v10, %s3673_s11 }
 0x84f   :  { %v714_v61 = vpop.permute.xlu0 %713 }
 0x850   :  { %3167 = vmatmul.mubr.msk.f32.vlgmr.msra.gmra.mxu1 %vm98_vm1, %v714_v61 }
 0x851   :  { %3181 = vmatpush3.msra.mxu1 %v3772_v19  ;;  %3188 = vmatprep.mubr.msk.f32.mxu1 %vm3677_vm0, %v3676_v0 }
 0x852   :  { %3182 = vmatprep.subr.mxu1 %v3676_v0 }
 0x853   :  { %3183 = vmatpush3.msra.mxu1 %v3776_v21  ;;  %v959_v11 = vpop.permute.xlu1 %958 }
 0x854   :  { %3184 = vmatprep.subr.mxu1 %v3676_v0  ;;  %3200 = vmatmul.mubr.msk.f32.vlgmr.msra.gmra.mxu0 %vm98_vm1, %v959_v11 }
 0x855   :  { %3214 = vmatpush3.msra.mxu0 %v3739_v1  ;;  %3185 = vmatpush3.msra.mxu1 %v3784_v23 }
 0x856   :  { %3215 = vmatprep.subr.mxu0 %v3676_v0  ;;  %3186 = vmatprep.subr.mxu1 %v3676_v0 }
 0x857   :  { %3216 = vmatpush3.msra.mxu0 %v3744_v2  ;;  %3187 = vmatpush3.msra.mxu1 %v3792_v25 }
 0x858   :  { %3217 = vmatprep.subr.mxu0 %v3676_v0  ;;  %3189 = vmatmul.mubr.msk.f32.vlgmr.msra.gmra.mxu1 %vm98_vm1, %v714_v61 }
 0x859   :  { %3218 = vmatpush3.msra.mxu0 %v3751_v3  ;;  %3221 = vmatprep.mubr.msk.f32.mxu0 %vm3677_vm0, %v3676_v0 }
 0x85a   :  { %3219 = vmatprep.subr.mxu0 %v3676_v0  ;;  %3202 = vmatprep.subr.mxu1 %v3676_v0 }
 0x85b   :  { %3220 = vmatpush3.msra.mxu0 %v3758_v4  ;;  %3203 = vmatpush3.msra.mxu1 %v3851_v62 }
 0x85c   :  { %3222 = vmatmul.mubr.msk.f32.vlgmr.msra.gmra.mxu0 %vm98_vm1, %v959_v11  ;;  %3235 = vmatprep.subr.mxu0 %v3676_v0 }
 0x85d   :  { %3204 = vmatprep.subr.mxu1 %v3676_v0  ;;  %3236 = vmatpush3.msra.mxu0 %v3774_v20 }
 0x85e   :  { %3205 = vmatpush3.msra.mxu1 %v3856_v63  ;;  %3237 = vmatprep.subr.mxu0 %v3676_v0 }
 0x85f   :  { %3206 = vmatprep.subr.mxu1 %v3676_v0  ;;  %3238 = vmatpush3.msra.mxu0 %v3780_v22 }
 0x860   :  { %3207 = vmatpush3.msra.mxu1 %v3863_v5  ;;  %3239 = vmatprep.subr.mxu0 %v3676_v0 }
 0x861   :  { %3208 = vmatprep.subr.mxu1 %v3676_v0  ;;  %3240 = vmatpush3.msra.mxu0 %v3786_v24 }
 0x862   :  { %3209 = vmatpush3.msra.mxu1 %v3870_v7  ;;  %3241 = vmatprep.subr.mxu0 %v3676_v0 }
 0x863   :  { %3210 = vmatprep.mubr.msk.f32.mxu1 %vm3677_vm0, %v3676_v0  ;;  %3224 = vmatprep.subr.mxu1 %v3676_v0 }
 0x864   :  { %3242 = vmatpush3.msra.mxu0 %v3794_v26  ;;  %3243 = vmatprep.mubr.msk.f32.mxu0 %vm3677_vm0, %v3676_v0 }
 0x865   :  { %3257 = vmatprep.subr.mxu0 %v3676_v0 }
 0x910   :  { %v783_v12 = vpop.f32.mrf.mxu1 }
 0x911   :  { %v784_v13 = vadd.f32 %v3927_v15, %v783_v12 }
 0x912   :  { %v3168_v14 = vpop.f32.mrf.mxu1 }
 0x913   :  { %3485 = vtanh.f32 %v784_v13 }
 0x914   :  { %v1028_v16 = vpop.f32.mrf.mxu0 }
 0x916   :  { %v3201_v17 = vpop.f32.mrf.mxu0 }
 0x917   :  { %v1481_v17 = vld [vmem:[#allocation2 + $0x8] sm:$0x3] }
 0x918   :  { %v953_v18 = vpop.f32.mrf.mxu1 }
 0x919   :  { %v1029_v27 = vadd.f32 %v1028_v16, %v953_v18 }
 0x91a   :  { %v3190_v28 = vpop.f32.mrf.mxu1 }
 0x91b   :  { %v1032_v30 = vadd.f32 %v3834_v33, %v1029_v27 }
 0x91c   :  { %v1203_v31 = vpop.f32.mrf.mxu0 }
 0x91d   :  { %3487 = vtanh.f32 %v1032_v30  ;;  %v1207_v32 = vadd.f32 %v1203_v31, %v1136_v29  ;;  %v2883_v38 = vmul.f32 -1.442695, %v1032_v30 }
 0x91e   :  { %v3223_v34 = vpop.f32.mrf.mxu0 }
 0x91f   :  { %3489 = vtanh.f32 %v1207_v32  ;;  %v2887_v39 = vmul.f32 -1.442695, %v1207_v32 }
 0x920   :  { %v3486_v35 = vpop.eup %3485  ;;  %3491 = vpow2.f32 %v2883_v38 }
 0x921   :  { %2878 = vst.msk [vmem:[%s4381_s7 + $0x2] sm:$0x3] %vm443_vm2, %v3486_v35  ;;  %3493 = vpow2.f32 %v2887_v39 }
 0x92a   :  { %v3488_v36 = vpop.eup %3487 }
 0x92b   :  { %1042 = vrot.lane.b32.xlu0 %v3488_v36, %s3678_s25 }
 0x92c   :  { %v3490_v37 = vpop.eup %3489 }
 0x92d   :  { %1217 = vrot.lane.b32.xlu1 %v3490_v37, %s3678_s25  ;;  %v3492_v40 = vpop.eup %3491 }
 0x92e   :  { %v3494_v41 = vpop.eup %3493  ;;  %v1036_v42 = vadd.f32 1.0, %v3492_v40 }
 0x92f   :  { %v1211_v43 = vadd.f32 1.0, %v3494_v41 }
 0x930   :  { %3495 = vrcp.f32 %v1036_v42 }
 0x931   :  { %3497 = vrcp.f32 %v1211_v43 }
 0x93d   :  { %v3496_v44 = vpop.eup %3495 }
 0x93e   :  { %v3498_v47 = vpop.eup %3497  ;;  %v1040_v50 = vmul.f32 %v3496_v44, %v3940_v55 }
 0x93f   :  { %v1215_v53 = vmul.f32 %v3498_v47, %v3944_v59 }
 0x99d   :  { %v1043_v45 = vpop.permute.xlu0 %1042 }
 0x99e   :  { %v1045_v46 = vmul.f32 %v3496_v44, %v1043_v45 }
 0x99f   :  { %v1218_v48 = vpop.permute.xlu1 %1217 }
 0x9a0   :  { %1047 = vrot.lane.b32.xlu0 %v1045_v46, %s3673_s11  ;;  %v1220_v49 = vmul.f32 %v3498_v47, %v1218_v48 }
 0x9a2   :  { %1222 = vrot.lane.b32.xlu1 %v1220_v49, %s3673_s11 }
 0xa12   :  { %v1048_v51 = vpop.permute.xlu0 %1047 }
 0xa13   :  { %v4006_v52 = vadd.f32 %v1048_v51, %v1040_v50 }
 0xa14   :  { %v1223_v54 = vpop.permute.xlu1 %1222 }
 0xa15   :  { %3499 = vtanh.f32 %v4006_v52  ;;  %v4010_v56 = vadd.f32 %v1223_v54, %v1215_v53 }
 0xa17   :  { %3501 = vtanh.f32 %v4010_v56 }
 0xa22   :  { %v3500_v57 = vpop.eup %3499 }
 0xa23   :  { %1053 = vrot.lane.b32.xlu0 %v3500_v57, %s3678_s25 }
 0xa24   :  { %v3502_v60 = vpop.eup %3501 }
 0xa25   :  { %1228 = vrot.lane.b32.xlu1 %v3502_v60, %s3678_s25 }
 0xa95   :  { %v1054_v6 = vpop.permute.xlu0 %1053 }
 0xa96   :  { %v1056_v55 = vmul.f32 %v3496_v44, %v1054_v6 }
 0xa97   :  { %v1229_v8 = vpop.permute.xlu1 %1228 }
 0xa98   :  { %1058 = vrot.lane.b32.xlu0 %v1056_v55, %s3673_s11  ;;  %v1231_v58 = vmul.f32 %v3498_v47, %v1229_v8 }
 0xa9a   :  { %1303 = vrot.lane.b32.xlu1 %v1231_v58, %s3673_s11 }
 0xb0a   :  { %v1059_v59 = vpop.permute.xlu0 %1058 }
 0xb0b   :  { %3211 = vmatmul.mubr.msk.f32.vlgmr.msra.gmra.mxu1 %vm98_vm1, %v1059_v59 }
 0xb0c   :  { %3225 = vmatpush3.msra.mxu1 %v3772_v19  ;;  %3232 = vmatprep.mubr.msk.f32.mxu1 %vm3677_vm0, %v3676_v0  ;;  %v1304_v9 = vpop.permute.xlu1 %1303 }
 0xb0d   :  { %3226 = vmatprep.subr.mxu1 %v3676_v0  ;;  %3244 = vmatmul.mubr.msk.f32.vlgmr.msra.gmra.mxu0 %vm98_vm1, %v1304_v9 }
 0xb0e   :  { %3227 = vmatpush3.msra.mxu1 %v3776_v21  ;;  %3258 = vmatpush3.msra.mxu0 %v3739_v1 }
 0xb0f   :  { %3228 = vmatprep.subr.mxu1 %v3676_v0  ;;  %3259 = vmatprep.subr.mxu0 %v3676_v0 }
 0xb10   :  { %3229 = vmatpush3.msra.mxu1 %v3784_v23  ;;  %3260 = vmatpush3.msra.mxu0 %v3744_v2 }
 0xb11   :  { %3230 = vmatprep.subr.mxu1 %v3676_v0  ;;  %3261 = vmatprep.subr.mxu0 %v3676_v0 }
 0xb12   :  { %3231 = vmatpush3.msra.mxu1 %v3792_v25  ;;  %3262 = vmatpush3.msra.mxu0 %v3751_v3 }
 0xb13   :  { %3233 = vmatmul.mubr.msk.f32.vlgmr.msra.gmra.mxu1 %vm98_vm1, %v1059_v59  ;;  %3263 = vmatprep.subr.mxu0 %v3676_v0 }
 0xb14   :  { %3265 = vmatprep.mubr.msk.f32.mxu0 %vm3677_vm0, %v3676_v0  ;;  %3264 = vmatpush3.msra.mxu0 %v3758_v4 }
 0xb15   :  { %3246 = vmatprep.subr.mxu1 %v3676_v0  ;;  %3266 = vmatmul.mubr.msk.f32.vlgmr.msra.gmra.mxu0 %vm98_vm1, %v1304_v9 }
 0xb16   :  { %3279 = vmatprep.subr.mxu0 %v3676_v0  ;;  %3247 = vmatpush3.msra.mxu1 %v3851_v62 }
 0xb17   :  { %3280 = vmatpush3.msra.mxu0 %v3774_v20  ;;  %3248 = vmatprep.subr.mxu1 %v3676_v0 }
 0xb18   :  { %3281 = vmatprep.subr.mxu0 %v3676_v0  ;;  %3249 = vmatpush3.msra.mxu1 %v3856_v63 }
 0xb19   :  { %3282 = vmatpush3.msra.mxu0 %v3780_v22  ;;  %3250 = vmatprep.subr.mxu1 %v3676_v0 }
 0xb1a   :  { %3283 = vmatprep.subr.mxu0 %v3676_v0  ;;  %3251 = vmatpush3.msra.mxu1 %v3863_v5 }
 0xb1b   :  { %3284 = vmatpush3.msra.mxu0 %v3786_v24  ;;  %3252 = vmatprep.subr.mxu1 %v3676_v0 }
 0xb1c   :  { %3285 = vmatprep.subr.mxu0 %v3676_v0  ;;  %3253 = vmatpush3.msra.mxu1 %v3870_v7 }
 0xb1d   :  { %3286 = vmatpush3.msra.mxu0 %v3794_v26  ;;  %3287 = vmatprep.mubr.msk.f32.mxu0 %vm3677_vm0, %v3676_v0 }
 0xb1e   :  { %3301 = vmatprep.subr.mxu0 %v3676_v0  ;;  %3254 = vmatprep.mubr.msk.f32.mxu1 %vm3677_vm0, %v3676_v0 }
 0xb1f   :  { %3268 = vmatprep.subr.mxu1 %v3676_v0 }
 0xbcb   :  { %v1128_v10 = vpop.f32.mrf.mxu1 }
 0xbcc   :  { %v1129_v61 = vadd.f32 %v3927_v15, %v1128_v10 }
 0xbcd   :  { %v3212_v11 = vpop.f32.mrf.mxu1  ;;  %v1373_v12 = vpop.f32.mrf.mxu0 }
 0xbce   :  { %3503 = vtanh.f32 %v1129_v61 }
 0xbcf   :  { %v3245_v13 = vpop.f32.mrf.mxu0 }
 0xbd3   :  { %v1298_v14 = vpop.f32.mrf.mxu1 }
 0xbd4   :  { %v1374_v16 = vadd.f32 %v1373_v12, %v1298_v14 }
 0xbd5   :  { %v3234_v18 = vpop.f32.mrf.mxu1  ;;  %v1548_v28 = vpop.f32.mrf.mxu0 }
 0xbd6   :  { %v1377_v27 = vadd.f32 %v3834_v33, %v1374_v16  ;;  %v1552_v29 = vadd.f32 %v1548_v28, %v1481_v17 }
 0xbd7   :  { %v3267_v30 = vpop.f32.mrf.mxu0 }
 0xbd8   :  { %3505 = vtanh.f32 %v1377_v27  ;;  %v2890_v35 = vmul.f32 -1.442695, %v1377_v27  ;;  %v2894_v36 = vmul.f32 -1.442695, %v1552_v29 }
 0xbd9   :  { %3507 = vtanh.f32 %v1552_v29 }
 0xbda   :  { %3509 = vpow2.f32 %v2890_v35 }
 0xbdb   :  { %v3504_v31 = vpop.eup %3503  ;;  %3511 = vpow2.f32 %v2894_v36 }
 0xbdc   :  { %2885 = vst.msk [vmem:[%s4381_s7 + $0x4] sm:$0x3] %vm443_vm2, %v3504_v31 }
 0xbe5   :  { %v3506_v32 = vpop.eup %3505 }
 0xbe6   :  { %v3508_v34 = vpop.eup %3507  ;;  %1387 = vrot.lane.b32.xlu0 %v3506_v32, %s3678_s25 }
 0xbe7   :  { %1562 = vrot.lane.b32.xlu1 %v3508_v34, %s3678_s25  ;;  %v3510_v37 = vpop.eup %3509 }
 0xbe8   :  { %v3512_v38 = vpop.eup %3511  ;;  %v1381_v39 = vadd.f32 1.0, %v3510_v37 }
 0xbe9   :  { %v1556_v40 = vadd.f32 1.0, %v3512_v38 }
 0xbea   :  { %3513 = vrcp.f32 %v1381_v39 }
 0xbeb   :  { %3515 = vrcp.f32 %v1556_v40 }
 0xbf7   :  { %v3514_v41 = vpop.eup %3513 }
 0xbf8   :  { %v3516_v43 = vpop.eup %3515  ;;  %v1385_v47 = vmul.f32 %v3514_v41, %v4006_v52 }
 0xbf9   :  { %v1560_v48 = vmul.f32 %v3516_v43, %v4010_v56 }
 0xc58   :  { %v1388_v42 = vpop.permute.xlu0 %1387 }
 0xc59   :  { %v1563_v44 = vpop.permute.xlu1 %1562  ;;  %v1390_v45 = vmul.f32 %v3514_v41, %v1388_v42 }
 0xc5a   :  { %v1565_v46 = vmul.f32 %v3516_v43, %v1563_v44  ;;  %v4153_v44 = vld [vmem:[%s4375_s1 + $0x18] sm:$0xff] }
 0xc5b   :  { %1392 = vrot.lane.b32.xlu0 %v1390_v45, %s3673_s11 }
 0xc5c   :  { %1567 = vrot.lane.b32.xlu1 %v1565_v46, %s3673_s11  ;;  %v4162_v46 = vld [vmem:[%s4375_s1 + $0x10] sm:$0xff] }
 0xccd   :  { %v1393_v49 = vpop.permute.xlu0 %1392 }
 0xcce   :  { %v1568_v50 = vpop.permute.xlu1 %1567  ;;  %v4073_v51 = vadd.f32 %v1393_v49, %v1385_v47  ;;  %v4166_v47 = vld [vmem:[#allocation6 + $0x18] sm:$0xff]  ;;  %v4177_v49 = vld [vmem:[#allocation6 + $0x10] sm:$0xff] }
 0xccf   :  { %v4075_v53 = vadd.f32 %v1568_v50, %v1560_v48  ;;  %v4174_v48 = vld [vmem:[%s4375_s1 + $0x8] sm:$0xff]  ;;  %v4185_v50 = vld [vmem:[%s4375_s1] sm:$0xff] }
 0xcd0   :  { %3517 = vtanh.f32 %v4073_v51 }
 0xcd1   :  { %3519 = vtanh.f32 %v4075_v53 }
 0xcdd   :  { %v3518_v54 = vpop.eup %3517 }
 0xcde   :  { %v3520_v57 = vpop.eup %3519  ;;  %1398 = vrot.lane.b32.xlu0 %v3518_v54, %s3678_s25  ;;  %v4200_v54 = vld [vmem:[#allocation4 + $0x18] sm:$0xff] }
 0xcdf   :  { %1573 = vrot.lane.b32.xlu1 %v3520_v57, %s3678_s25  ;;  %v4205_v57 = vld [vmem:[#allocation4 + $0x10] sm:$0xff] }
 0xd50   :  { %v1399_v60 = vpop.permute.xlu0 %1398 }
 0xd51   :  { %v1574_v52 = vpop.permute.xlu1 %1573  ;;  %v1401_v6 = vmul.f32 %v3514_v41, %v1399_v60  ;;  %v4211_v60 = vld [vmem:[#allocation4 + $0x8] sm:$0xff] }
 0xd52   :  { %v1576_v56 = vmul.f32 %v3516_v43, %v1574_v52  ;;  %v4218_v52 = vld [vmem:[#allocation4] sm:$0xff] }
 0xd53   :  { %1403 = vrot.lane.b32.xlu0 %v1401_v6, %s3673_s11 }
 0xd54   :  { %1648 = vrot.lane.b32.xlu1 %v1576_v56, %s3673_s11 }
 0xdc5   :  { %v1404_v55 = vpop.permute.xlu0 %1403 }
 0xdc6   :  { %v1649_v8 = vpop.permute.xlu1 %1648  ;;  %3255 = vmatmul.mubr.msk.f32.vlgmr.msra.gmra.mxu1 %vm98_vm1, %v1404_v55 }
 0xdc7   :  { %3288 = vmatmul.mubr.msk.f32.vlgmr.msra.gmra.mxu0 %vm98_vm1, %v1649_v8  ;;  %3269 = vmatpush3.msra.mxu1 %v3772_v19 }
 0xdc8   :  { %3302 = vmatpush3.msra.mxu0 %v3739_v1  ;;  %3270 = vmatprep.subr.mxu1 %v3676_v0 }
 0xdc9   :  { %3303 = vmatprep.subr.mxu0 %v3676_v0  ;;  %3271 = vmatpush3.msra.mxu1 %v3776_v21 }
 0xdca   :  { %3304 = vmatpush3.msra.mxu0 %v3744_v2  ;;  %3272 = vmatprep.subr.mxu1 %v3676_v0 }
 0xdcb   :  { %3305 = vmatprep.subr.mxu0 %v3676_v0  ;;  %3273 = vmatpush3.msra.mxu1 %v3784_v23 }
 0xdcc   :  { %3306 = vmatpush3.msra.mxu0 %v3751_v3  ;;  %3274 = vmatprep.subr.mxu1 %v3676_v0 }
 0xdcd   :  { %3307 = vmatprep.subr.mxu0 %v3676_v0  ;;  %3309 = vmatprep.mubr.msk.f32.mxu0 %vm3677_vm0, %v3676_v0 }
 0xdce   :  { %3308 = vmatpush3.msra.mxu0 %v3758_v4  ;;  %3275 = vmatpush3.msra.mxu1 %v3792_v25 }
 0xdcf   :  { %3276 = vmatprep.mubr.msk.f32.mxu1 %vm3677_vm0, %v3676_v0  ;;  %3310 = vmatmul.mubr.msk.f32.vlgmr.msra.gmra.mxu0 %vm98_vm1, %v1649_v8  ;;  %v2171_v8 = vld [vmem:[#allocation2 + $0xc] sm:$0x3] }
 0xdd0   :  { %3277 = vmatmul.mubr.msk.f32.vlgmr.msra.gmra.mxu1 %vm98_vm1, %v1404_v55  ;;  %3323 = vmatprep.subr.mxu0 %v3676_v0 }
 0xdd1   :  { %3324 = vmatpush3.msra.mxu0 %v3774_v20  ;;  %3290 = vmatprep.subr.mxu1 %v3676_v0  ;;  %v1826_v20 = vld [vmem:[#allocation2 + $0xa] sm:$0x3] }
 0xdd2   :  { %3325 = vmatprep.subr.mxu0 %v3676_v0  ;;  %3291 = vmatpush3.msra.mxu1 %v3851_v62 }
 0xdd3   :  { %3326 = vmatpush3.msra.mxu0 %v3780_v22  ;;  %3292 = vmatprep.subr.mxu1 %v3676_v0 }
 0xdd4   :  { %3327 = vmatprep.subr.mxu0 %v3676_v0  ;;  %3293 = vmatpush3.msra.mxu1 %v3856_v63 }
 0xdd5   :  { %3328 = vmatpush3.msra.mxu0 %v3786_v24  ;;  %3294 = vmatprep.subr.mxu1 %v3676_v0 }
 0xdd6   :  { %3329 = vmatprep.subr.mxu0 %v3676_v0  ;;  %3295 = vmatpush3.msra.mxu1 %v3863_v5 }
 0xdd7   :  { %3330 = vmatpush3.msra.mxu0 %v3794_v26  ;;  %3331 = vmatprep.mubr.msk.f32.mxu0 %vm3677_vm0, %v3676_v0 }
 0xdd8   :  { %3345 = vmatprep.subr.mxu0 %v3676_v0  ;;  %3296 = vmatprep.subr.mxu1 %v3676_v0 }
 0xdd9   :  { %3297 = vmatpush3.msra.mxu1 %v3870_v7  ;;  %3298 = vmatprep.mubr.msk.f32.mxu1 %vm3677_vm0, %v3676_v0 }
 0xdda   :  { %3312 = vmatprep.subr.mxu1 %v3676_v0 }
 0xe86   :  { %v1473_v1 = vpop.f32.mrf.mxu1 }
 0xe87   :  { %v1718_v2 = vpop.f32.mrf.mxu0  ;;  %v1474_v3 = vadd.f32 %v3927_v15, %v1473_v1 }
 0xe88   :  { %v3256_v4 = vpop.f32.mrf.mxu1 }
 0xe89   :  { %3521 = vtanh.f32 %v1474_v3  ;;  %v3289_v19 = vpop.f32.mrf.mxu0 }
 0xe8f   :  { %v1893_v21 = vpop.f32.mrf.mxu0 }
 0xe90   :  { %v1897_v22 = vadd.f32 %v1893_v21, %v1826_v20  ;;  %v1643_v23 = vpop.f32.mrf.mxu1 }
 0xe91   :  { %v1719_v24 = vadd.f32 %v1718_v2, %v1643_v23  ;;  %v3311_v25 = vpop.f32.mrf.mxu0 }
 0xe92   :  { %3523 = vtanh.f32 %v1897_v22  ;;  %v3278_v26 = vpop.f32.mrf.mxu1  ;;  %v2901_v61 = vmul.f32 -1.442695, %v1897_v22 }
 0xe93   :  { %v1722_v58 = vadd.f32 %v3834_v33, %v1719_v24 }
 0xe95   :  { %3525 = vtanh.f32 %v1722_v58  ;;  %v2897_v11 = vmul.f32 -1.442695, %v1722_v58 }
 0xe96   :  { %v3522_v59 = vpop.eup %3521  ;;  %3527 = vpow2.f32 %v2901_v61 }
 0xe97   :  { %2892 = vst.msk [vmem:[%s4381_s7 + $0x6] sm:$0x3] %vm443_vm2, %v3522_v59  ;;  %3529 = vpow2.f32 %v2897_v11 }
 0xe9f   :  { %v3524_v9 = vpop.eup %3523 }
 0xea0   :  { %1907 = vrot.lane.b32.xlu1 %v3524_v9, %s3678_s25 }
 0xea2   :  { %v3526_v10 = vpop.eup %3525 }
 0xea3   :  { %1732 = vrot.lane.b32.xlu0 %v3526_v10, %s3678_s25  ;;  %v3528_v12 = vpop.eup %3527 }
 0xea4   :  { %v3530_v13 = vpop.eup %3529  ;;  %v1901_v33 = vadd.f32 1.0, %v3528_v12 }
 0xea5   :  { %v1726_v14 = vadd.f32 1.0, %v3530_v13 }
 0xea6   :  { %3531 = vrcp.f32 %v1901_v33 }
 0xea7   :  { %3533 = vrcp.f32 %v1726_v14 }
 0xeb3   :  { %v3532_v16 = vpop.eup %3531 }
 0xeb4   :  { %v3534_v27 = vpop.eup %3533  ;;  %v1905_v30 = vmul.f32 %v3532_v16, %v4075_v53  ;;  %v4195_v53 = vld [vmem:[#allocation6] sm:$0xff] }
 0xeb5   :  { %v1730_v34 = vmul.f32 %v3534_v27, %v4073_v51  ;;  %v4188_v51 = vld [vmem:[#allocation6 + $0x8] sm:$0xff] }
 0xf12   :  { %v1908_v17 = vpop.permute.xlu1 %1907 }
 0xf13   :  { %v1910_v18 = vmul.f32 %v3532_v16, %v1908_v17 }
 0xf15   :  { %v1733_v28 = vpop.permute.xlu0 %1732  ;;  %1912 = vrot.lane.b32.xlu1 %v1910_v18, %s3673_s11 }
 0xf16   :  { %v1735_v29 = vmul.f32 %v3534_v27, %v1733_v28 }
 0xf18   :  { %1737 = vrot.lane.b32.xlu0 %v1735_v29, %s3673_s11 }
 0xf87   :  { %v1913_v31 = vpop.permute.xlu1 %1912 }
 0xf88   :  { %v4138_v32 = vadd.f32 %v1913_v31, %v1905_v30 }
 0xf8a   :  { %3535 = vtanh.f32 %v4138_v32  ;;  %v1738_v35 = vpop.permute.xlu0 %1737 }
 0xf8b   :  { %v4142_v36 = vadd.f32 %v1738_v35, %v1730_v34 }
 0xf8d   :  { %3537 = vtanh.f32 %v4142_v36 }
 0xf97   :  { %v3536_v37 = vpop.eup %3535 }
 0xf98   :  { %1918 = vrot.lane.b32.xlu1 %v3536_v37, %s3678_s25 }
 0xf9a   :  { %v3538_v38 = vpop.eup %3537 }
 0xf9b   :  { %1743 = vrot.lane.b32.xlu0 %v3538_v38, %s3678_s25  ;;  %v4288_v38 = vld [vmem:[%s4379_s5 + $0x18] sm:$0xff] }
0x100a   :  { %v1919_v39 = vpop.permute.xlu1 %1918 }
0x100b   :  { %v1921_v40 = vmul.f32 %v3532_v16, %v1919_v39  ;;  %v4299_v39 = vld [vmem:[%s4379_s5 + $0x10] sm:$0xff] }
0x100d   :  { %v1744_v41 = vpop.permute.xlu0 %1743  ;;  %1993 = vrot.lane.b32.xlu1 %v1921_v40, %s3673_s11  ;;  %v4308_v40 = vld [vmem:[%s4379_s5 + $0x8] sm:$0xff] }
0x100e   :  { %v1746_v42 = vmul.f32 %v3534_v27, %v1744_v41  ;;  %v4315_v41 = vld [vmem:[%s4379_s5] sm:$0xff] }
0x1010   :  { %1748 = vrot.lane.b32.xlu0 %v1746_v42, %s3673_s11 }
0x107f   :  { %v1994_v43 = vpop.permute.xlu1 %1993 }
0x1080   :  { %3332 = vmatmul.mubr.msk.f32.vlgmr.msra.gmra.mxu0 %vm98_vm1, %v1994_v43 }
0x1081   :  { %3346 = vmatpush3.msra.mxu0 %v4153_v44  ;;  %3353 = vmatprep.mubr.msk.f32.mxu0 %vm3677_vm0, %v3676_v0 }
0x1082   :  { %3347 = vmatprep.subr.mxu0 %v3676_v0  ;;  %v1749_v45 = vpop.permute.xlu0 %1748 }
0x1083   :  { %3348 = vmatpush3.msra.mxu0 %v4162_v46  ;;  %3299 = vmatmul.mubr.msk.f32.vlgmr.msra.gmra.mxu1 %vm98_vm1, %v1749_v45 }
0x1084   :  { %3313 = vmatpush3.msra.mxu1 %v4166_v47  ;;  %3349 = vmatprep.subr.mxu0 %v3676_v0 }
0x1085   :  { %3314 = vmatprep.subr.mxu1 %v3676_v0  ;;  %3350 = vmatpush3.msra.mxu0 %v4174_v48 }
0x1086   :  { %3315 = vmatpush3.msra.mxu1 %v4177_v49  ;;  %3351 = vmatprep.subr.mxu0 %v3676_v0 }
0x1087   :  { %3316 = vmatprep.subr.mxu1 %v3676_v0  ;;  %3352 = vmatpush3.msra.mxu0 %v4185_v50 }
0x1088   :  { %3317 = vmatpush3.msra.mxu1 %v4188_v51  ;;  %3354 = vmatmul.mubr.msk.f32.vlgmr.msra.gmra.mxu0 %vm98_vm1, %v1994_v43 }
0x1089   :  { %3318 = vmatprep.subr.mxu1 %v3676_v0  ;;  %3320 = vmatprep.mubr.msk.f32.mxu1 %vm3677_vm0, %v3676_v0 }
0x108a   :  { %3319 = vmatpush3.msra.mxu1 %v4195_v53  ;;  %3367 = vmatprep.subr.mxu0 %v3676_v0 }
0x108b   :  { %3321 = vmatmul.mubr.msk.f32.vlgmr.msra.gmra.mxu1 %vm98_vm1, %v1749_v45  ;;  %3368 = vmatpush3.msra.mxu0 %v4200_v54 }
0x108c   :  { %3369 = vmatprep.subr.mxu0 %v3676_v0  ;;  %3334 = vmatprep.subr.mxu1 %v3676_v0 }
0x108d   :  { %3370 = vmatpush3.msra.mxu0 %v4205_v57  ;;  %3335 = vmatpush3.msra.mxu1 %v3851_v62 }
0x108e   :  { %3371 = vmatprep.subr.mxu0 %v3676_v0  ;;  %3336 = vmatprep.subr.mxu1 %v3676_v0 }
0x108f   :  { %3372 = vmatpush3.msra.mxu0 %v4211_v60  ;;  %3337 = vmatpush3.msra.mxu1 %v3856_v63 }
0x1090   :  { %3373 = vmatprep.subr.mxu0 %v3676_v0  ;;  %3375 = vmatprep.mubr.msk.f32.mxu0 %vm3677_vm0, %v3676_v0 }
0x1091   :  { %3374 = vmatpush3.msra.mxu0 %v4218_v52  ;;  %3338 = vmatprep.subr.mxu1 %v3676_v0 }
0x1092   :  { %3389 = vmatprep.subr.mxu0 %v3676_v0  ;;  %3339 = vmatpush3.msra.mxu1 %v3863_v5 }
0x1093   :  { %3340 = vmatprep.subr.mxu1 %v3676_v0  ;;  %3342 = vmatprep.mubr.msk.f32.mxu1 %vm3677_vm0, %v3676_v0 }
0x1094   :  { %3341 = vmatpush3.msra.mxu1 %v3870_v7  ;;  %v4233_v7 = vld [vmem:[%s4378_s4] ss:$0 sm:$0xff] }
0x1095   :  { %3356 = vmatprep.subr.mxu1 %v3676_v0 }
0x1140   :  { %v2063_v62 = vpop.f32.mrf.mxu0 }
0x1142   :  { %v3333_v63 = vpop.f32.mrf.mxu0 }
0x1143   :  { %v1818_v6 = vpop.f32.mrf.mxu1 }
0x1144   :  { %v1819_v56 = vadd.f32 %v3927_v15, %v1818_v6 }
0x1145   :  { %v3300_v55 = vpop.f32.mrf.mxu1 }
0x1146   :  { %3539 = vtanh.f32 %v1819_v56 }
0x1148   :  { %v2238_v1 = vpop.f32.mrf.mxu0 }
0x1149   :  { %v2242_v2 = vadd.f32 %v2238_v1, %v2171_v8 }
0x114a   :  { %v3355_v5 = vpop.f32.mrf.mxu0 }
0x114b   :  { %3541 = vtanh.f32 %v2242_v2  ;;  %v1988_v3 = vpop.f32.mrf.mxu1  ;;  %v2908_v24 = vmul.f32 -1.442695, %v2242_v2 }
0x114c   :  { %v2064_v4 = vadd.f32 %v2063_v62, %v1988_v3 }
0x114d   :  { %v3322_v19 = vpop.f32.mrf.mxu1 }
0x114e   :  { %v2067_v20 = vadd.f32 %v4233_v7, %v2064_v4 }
0x1150   :  { %3543 = vtanh.f32 %v2067_v20  ;;  %v2904_v25 = vmul.f32 -1.442695, %v2067_v20 }
0x1151   :  { %3545 = vpow2.f32 %v2908_v24 }
0x1152   :  { %3547 = vpow2.f32 %v2904_v25 }
0x1153   :  { %v3540_v21 = vpop.eup %3539 }
0x1154   :  { %2899 = vst.msk [vmem:[%s4381_s7 + $0x8] sm:$0x3] %vm443_vm2, %v3540_v21 }
0x1158   :  { %v3542_v22 = vpop.eup %3541 }
0x1159   :  { %2252 = vrot.lane.b32.xlu1 %v3542_v22, %s3678_s25 }
0x115d   :  { %v3544_v23 = vpop.eup %3543 }
0x115e   :  { %2077 = vrot.lane.b32.xlu0 %v3544_v23, %s3678_s25  ;;  %v3546_v26 = vpop.eup %3545 }
0x115f   :  { %v2246_v58 = vadd.f32 1.0, %v3546_v26  ;;  %v3548_v59 = vpop.eup %3547 }
0x1160   :  { %v2071_v9 = vadd.f32 1.0, %v3548_v59 }
0x1161   :  { %3549 = vrcp.f32 %v2246_v58 }
0x1162   :  { %3551 = vrcp.f32 %v2071_v9 }
0x116e   :  { %v3550_v10 = vpop.eup %3549 }
0x116f   :  { %v3552_v12 = vpop.eup %3551  ;;  %v2250_v14 = vmul.f32 %v3550_v10, %v4138_v32 }
0x1170   :  { %v2075_v18 = vmul.f32 %v3552_v12, %v4142_v36 }
0x11cb   :  { %v2253_v61 = vpop.permute.xlu1 %2252 }
0x11cc   :  { %v2255_v11 = vmul.f32 %v3550_v10, %v2253_v61 }
0x11ce   :  { %2257 = vrot.lane.b32.xlu1 %v2255_v11, %s3673_s11 }
0x11d0   :  { %v2078_v13 = vpop.permute.xlu0 %2077 }
0x11d1   :  { %v2080_v33 = vmul.f32 %v3552_v12, %v2078_v13 }
0x11d3   :  { %2082 = vrot.lane.b32.xlu0 %v2080_v33, %s3673_s11 }
0x1240   :  { %v2258_v16 = vpop.permute.xlu1 %2257 }
0x1241   :  { %v4245_v17 = vadd.f32 %v2258_v16, %v2250_v14 }
0x1243   :  { %3553 = vtanh.f32 %v4245_v17 }
0x1245   :  { %v2083_v27 = vpop.permute.xlu0 %2082 }
0x1246   :  { %v4249_v28 = vadd.f32 %v2083_v27, %v2075_v18 }
0x1248   :  { %3555 = vtanh.f32 %v4249_v28 }
0x1250   :  { %v3554_v29 = vpop.eup %3553 }
0x1251   :  { %2263 = vrot.lane.b32.xlu1 %v3554_v29, %s3678_s25 }
0x1255   :  { %v3556_v30 = vpop.eup %3555 }
0x1256   :  { %2088 = vrot.lane.b32.xlu0 %v3556_v30, %s3678_s25 }
0x12c3   :  { %v2264_v31 = vpop.permute.xlu1 %2263 }
0x12c4   :  { %v2266_v32 = vmul.f32 %v3550_v10, %v2264_v31 }
0x12c6   :  { %2338 = vrot.lane.b32.xlu1 %v2266_v32, %s3673_s11 }
0x12c8   :  { %v2089_v34 = vpop.permute.xlu0 %2088 }
0x12c9   :  { %v2091_v35 = vmul.f32 %v3552_v12, %v2089_v34 }
0x12cb   :  { %2093 = vrot.lane.b32.xlu0 %v2091_v35, %s3673_s11 }
0x1338   :  { %v2339_v36 = vpop.permute.xlu1 %2338 }
0x1339   :  { %3376 = vmatmul.mubr.msk.f32.vlgmr.msra.gmra.mxu0 %vm98_vm1, %v2339_v36 }
0x133a   :  { %3390 = vmatpush3.msra.mxu0 %v4153_v44  ;;  %3397 = vmatprep.mubr.msk.f32.mxu0 %vm3677_vm0, %v3676_v0 }
0x133b   :  { %3391 = vmatprep.subr.mxu0 %v3676_v0 }
0x133c   :  { %3392 = vmatpush3.msra.mxu0 %v4162_v46  ;;  %v2516_v46 = vld [vmem:[#allocation2 + $0xe] sm:$0x3] }
0x133d   :  { %3393 = vmatprep.subr.mxu0 %v3676_v0  ;;  %v2094_v37 = vpop.permute.xlu0 %2093 }
0x133e   :  { %3394 = vmatpush3.msra.mxu0 %v4174_v48  ;;  %3343 = vmatmul.mubr.msk.f32.vlgmr.msra.gmra.mxu1 %vm98_vm1, %v2094_v37 }
0x133f   :  { %3357 = vmatpush3.msra.mxu1 %v4166_v47  ;;  %3395 = vmatprep.subr.mxu0 %v3676_v0 }
0x1340   :  { %3358 = vmatprep.subr.mxu1 %v3676_v0  ;;  %3396 = vmatpush3.msra.mxu0 %v4185_v50 }
0x1341   :  { %3359 = vmatpush3.msra.mxu1 %v4177_v49  ;;  %3398 = vmatmul.mubr.msk.f32.vlgmr.msra.gmra.mxu0 %vm98_vm1, %v2339_v36 }
0x1342   :  { %3360 = vmatprep.subr.mxu1 %v3676_v0  ;;  %3364 = vmatprep.mubr.msk.f32.mxu1 %vm3677_vm0, %v3676_v0 }
0x1343   :  { %3361 = vmatpush3.msra.mxu1 %v4188_v51  ;;  %3411 = vmatprep.subr.mxu0 %v3676_v0 }
0x1344   :  { %3362 = vmatprep.subr.mxu1 %v3676_v0  ;;  %3412 = vmatpush3.msra.mxu0 %v4200_v54 }
0x1345   :  { %3363 = vmatpush3.msra.mxu1 %v4195_v53  ;;  %3413 = vmatprep.subr.mxu0 %v3676_v0 }
0x1346   :  { %3365 = vmatmul.mubr.msk.f32.vlgmr.msra.gmra.mxu1 %vm98_vm1, %v2094_v37  ;;  %3414 = vmatpush3.msra.mxu0 %v4205_v57 }
0x1347   :  { %3415 = vmatprep.subr.mxu0 %v3676_v0  ;;  %3378 = vmatprep.subr.mxu1 %v3676_v0 }
0x1348   :  { %3416 = vmatpush3.msra.mxu0 %v4211_v60  ;;  %3379 = vmatpush3.msra.mxu1 %v4288_v38 }
0x1349   :  { %3417 = vmatprep.subr.mxu0 %v3676_v0  ;;  %3419 = vmatprep.mubr.msk.f32.mxu0 %vm3677_vm0, %v3676_v0 }
0x134a   :  { %3418 = vmatpush3.msra.mxu0 %v4218_v52  ;;  %3380 = vmatprep.subr.mxu1 %v3676_v0 }
0x134b   :  { %3381 = vmatpush3.msra.mxu1 %v4299_v39  ;;  %3386 = vmatprep.mubr.msk.f32.mxu1 %vm3677_vm0, %v3676_v0 }
0x134c   :  { %3382 = vmatprep.subr.mxu1 %v3676_v0 }
0x134d   :  { %3383 = vmatpush3.msra.mxu1 %v4308_v40 }
0x134e   :  { %3384 = vmatprep.subr.mxu1 %v3676_v0 }
0x134f   :  { %3385 = vmatpush3.msra.mxu1 %v4315_v41 }
0x1350   :  { %3400 = vmatprep.subr.mxu1 %v3676_v0 }
0x13f9   :  { %v2408_v42 = vpop.f32.mrf.mxu0 }
0x13fb   :  { %v3377_v43 = vpop.f32.mrf.mxu0 }
0x13fe   :  { %v2163_v44 = vpop.f32.mrf.mxu1 }
0x13ff   :  { %v2164_v45 = vadd.f32 %v3927_v15, %v2163_v44 }
0x1400   :  { %v3344_v48 = vpop.f32.mrf.mxu1 }
0x1401   :  { %3557 = vtanh.f32 %v2164_v45  ;;  %v2583_v50 = vpop.f32.mrf.mxu0 }
0x1402   :  { %v2587_v54 = vadd.f32 %v2583_v50, %v2516_v46 }
0x1403   :  { %v3399_v57 = vpop.f32.mrf.mxu0 }
0x1404   :  { %3559 = vtanh.f32 %v2587_v54  ;;  %v2915_v55 = vmul.f32 -1.442695, %v2587_v54 }
0x1406   :  { %v2333_v60 = vpop.f32.mrf.mxu1 }
0x1407   :  { %v2409_v52 = vadd.f32 %v2408_v42, %v2333_v60 }
0x1408   :  { %v3366_v62 = vpop.f32.mrf.mxu1 }
0x1409   :  { %v2412_v63 = vadd.f32 %v4233_v7, %v2409_v52 }
0x140b   :  { %3561 = vtanh.f32 %v2412_v63  ;;  %v2911_v8 = vmul.f32 -1.442695, %v2412_v63 }
0x140c   :  { %3563 = vpow2.f32 %v2915_v55 }
0x140d   :  { %3565 = vpow2.f32 %v2911_v8 }
0x140e   :  { %v3558_v6 = vpop.eup %3557 }
0x140f   :  { %2906 = vst.msk [vmem:[%s4381_s7 + $0xa] sm:$0x3] %vm443_vm2, %v3558_v6 }
0x1411   :  { %v3560_v15 = vpop.eup %3559 }
0x1412   :  { %2597 = vrot.lane.b32.xlu1 %v3560_v15, %s3678_s25 }
0x1418   :  { %v3562_v56 = vpop.eup %3561 }
0x1419   :  { %2422 = vrot.lane.b32.xlu0 %v3562_v56, %s3678_s25  ;;  %v3564_v1 = vpop.eup %3563 }
0x141a   :  { %v2591_v2 = vadd.f32 1.0, %v3564_v1  ;;  %v3566_v5 = vpop.eup %3565 }
0x141b   :  { %v2416_v3 = vadd.f32 1.0, %v3566_v5 }
0x141c   :  { %3567 = vrcp.f32 %v2591_v2 }
0x141d   :  { %3569 = vrcp.f32 %v2416_v3 }
0x1429   :  { %v3568_v4 = vpop.eup %3567 }
0x142a   :  { %v3570_v21 = vpop.eup %3569  ;;  %v2595_v24 = vmul.f32 %v3568_v4, %v4245_v17 }
0x142b   :  { %v2420_v58 = vmul.f32 %v3570_v21, %v4249_v28 }
0x1484   :  { %v2598_v19 = vpop.permute.xlu1 %2597 }
0x1485   :  { %v2600_v20 = vmul.f32 %v3568_v4, %v2598_v19 }
0x1487   :  { %2602 = vrot.lane.b32.xlu1 %v2600_v20, %s3673_s11 }
0x148b   :  { %v2423_v22 = vpop.permute.xlu0 %2422 }
0x148c   :  { %v2425_v23 = vmul.f32 %v3570_v21, %v2423_v22 }
0x148e   :  { %2427 = vrot.lane.b32.xlu0 %v2425_v23, %s3673_s11 }
0x14f9   :  { %v2603_v25 = vpop.permute.xlu1 %2602 }
0x14fa   :  { %v2605_v26 = vadd.f32 %v2603_v25, %v2595_v24 }
0x14fc   :  { %3571 = vtanh.f32 %v2605_v26 }
0x1500   :  { %v2428_v59 = vpop.permute.xlu0 %2427 }
0x1501   :  { %v2430_v9 = vadd.f32 %v2428_v59, %v2420_v58 }
0x1503   :  { %3573 = vtanh.f32 %v2430_v9 }
0x1509   :  { %v3572_v10 = vpop.eup %3571 }
0x150a   :  { %2608 = vrot.lane.b32.xlu1 %v3572_v10, %s3678_s25 }
0x1510   :  { %v3574_v61 = vpop.eup %3573 }
0x1511   :  { %2433 = vrot.lane.b32.xlu0 %v3574_v61, %s3678_s25 }
0x157c   :  { %v2609_v11 = vpop.permute.xlu1 %2608 }
0x157d   :  { %v2611_v12 = vmul.f32 %v3568_v4, %v2609_v11 }
0x157f   :  { %2683 = vrot.lane.b32.xlu1 %v2611_v12, %s3673_s11 }
0x1583   :  { %v2434_v13 = vpop.permute.xlu0 %2433 }
0x1584   :  { %v2436_v33 = vmul.f32 %v3570_v21, %v2434_v13 }
0x1586   :  { %2438 = vrot.lane.b32.xlu0 %v2436_v33, %s3673_s11 }
0x15f1   :  { %v2684_v14 = vpop.permute.xlu1 %2683 }
0x15f2   :  { %3420 = vmatmul.mubr.msk.f32.vlgmr.msra.gmra.mxu0 %vm98_vm1, %v2684_v14 }
0x15f8   :  { %v2439_v16 = vpop.permute.xlu0 %2438 }
0x15f9   :  { %3387 = vmatmul.mubr.msk.f32.vlgmr.msra.gmra.mxu1 %vm98_vm1, %v2439_v16 }
0x15fa   :  { %3401 = vmatpush3.msra.mxu1 %v4166_v47  ;;  %3408 = vmatprep.mubr.msk.f32.mxu1 %vm3677_vm0, %v3676_v0 }
0x15fb   :  { %3402 = vmatprep.subr.mxu1 %v3676_v0 }
0x15fc   :  { %3403 = vmatpush3.msra.mxu1 %v4177_v49 }
0x15fd   :  { %3404 = vmatprep.subr.mxu1 %v3676_v0 }
0x15fe   :  { %3405 = vmatpush3.msra.mxu1 %v4188_v51 }
0x15ff   :  { %3406 = vmatprep.subr.mxu1 %v3676_v0 }
0x1600   :  { %3407 = vmatpush3.msra.mxu1 %v4195_v53  ;;  %v3604_v53 = vld [vmem:[%s4380_s6] ss:$0 sm:$0xff] }
0x1601   :  { %3409 = vmatmul.mubr.msk.f32.vlgmr.msra.gmra.mxu1 %vm98_vm1, %v2439_v16  ;;  %3422 = vmatprep.subr.mxu1 %v3676_v0 }
0x1602   :  { %3423 = vmatpush3.msra.mxu1 %v4288_v38  ;;  %3430 = vmatprep.mubr.msk.f32.mxu1 %vm3677_vm0, %v3676_v0 }
0x1603   :  { %3424 = vmatprep.subr.mxu1 %v3676_v0 }
0x1604   :  { %3425 = vmatpush3.msra.mxu1 %v4299_v39 }
0x1605   :  { %3426 = vmatprep.subr.mxu1 %v3676_v0 }
0x1606   :  { %3427 = vmatpush3.msra.mxu1 %v4308_v40 }
0x1607   :  { %3428 = vmatprep.subr.mxu1 %v3676_v0 }
0x1608   :  { %3429 = vmatpush3.msra.mxu1 %v4315_v41 }
0x16b2   :  { %v2753_v47 = vpop.f32.mrf.mxu0 }
0x16b4   :  { %v3421_v49 = vpop.f32.mrf.mxu0 }
0x16b9   :  { %v2508_v51 = vpop.f32.mrf.mxu1 }
0x16ba   :  { %v2509_v17 = vadd.f32 %v3604_v53, %v2508_v51 }
0x16bb   :  { %v3388_v18 = vpop.f32.mrf.mxu1 }
0x16bc   :  { %3575 = vtanh.f32 %v2509_v17 }
0x16c1   :  { %v2678_v27 = vpop.f32.mrf.mxu1 }
0x16c2   :  { %v2754_v28 = vadd.f32 %v2753_v47, %v2678_v27 }
0x16c3   :  { %v3410_v29 = vpop.f32.mrf.mxu1 }
0x16c4   :  { %v2757_v30 = vadd.f32 %v4233_v7, %v2754_v28 }
0x16c6   :  { %3577 = vtanh.f32 %v2757_v30  ;;  %v2918_v32 = vmul.f32 -1.442695, %v2757_v30 }
0x16c8   :  { %3579 = vpow2.f32 %v2918_v32 }
0x16c9   :  { %v3576_v31 = vpop.eup %3575 }
0x16ca   :  { %2913 = vst.msk [vmem:[%s4381_s7 + $0xc] sm:$0x3] %vm443_vm2, %v3576_v31 }
0x16d3   :  { %v3578_v0 = vpop.eup %3577 }
0x16d4   :  { %2767 = vrot.lane.b32.xlu0 %v3578_v0, %s3678_s25 }
0x16d5   :  { %v3580_v34 = vpop.eup %3579 }
0x16d6   :  { %v2761_v35 = vadd.f32 1.0, %v3580_v34 }
0x16d8   :  { %3581 = vrcp.f32 %v2761_v35 }
0x16e5   :  { %v3582_v36 = vpop.eup %3581 }
0x16e6   :  { %v2765_v7 = vmul.f32 %v3582_v36, %v2430_v9 }
0x1746   :  { %v2768_v37 = vpop.permute.xlu0 %2767 }
0x1747   :  { %v2770_v38 = vmul.f32 %v3582_v36, %v2768_v37 }
0x1749   :  { %2772 = vrot.lane.b32.xlu1 %v2770_v38, %s3673_s11 }
0x17bb   :  { %v2773_v39 = vpop.permute.xlu1 %2772 }
0x17bc   :  { %v2775_v40 = vadd.f32 %v2773_v39, %v2765_v7 }
0x17be   :  { %3583 = vtanh.f32 %v2775_v40 }
0x17cb   :  { %v3584_v41 = vpop.eup %3583 }
0x17cc   :  { %2778 = vrot.lane.b32.xlu0 %v3584_v41, %s3678_s25 }
0x183e   :  { %v2779_v42 = vpop.permute.xlu0 %2778 }
0x183f   :  { %v2781_v43 = vmul.f32 %v3582_v36, %v2779_v42 }
0x1841   :  { %2783 = vrot.lane.b32.xlu1 %v2781_v43, %s3673_s11 }
0x18b3   :  { %v2784_v44 = vpop.permute.xlu1 %2783 }
0x18b4   :  { %3431 = vmatmul.mubr.msk.f32.vlgmr.msra.gmra.mxu1 %vm98_vm1, %v2784_v44 }
0x1974   :  { %v2853_v45 = vpop.f32.mrf.mxu1 }
0x1975   :  { %v2854_v46 = vadd.f32 %v3604_v53, %v2853_v45 }
0x1976   :  { %v3432_v48 = vpop.f32.mrf.mxu1 }
0x1977   :  { %3585 = vtanh.f32 %v2854_v46 }
0x1984   :  { %v3586_v50 = vpop.eup %3585 }
0x1985   :  { %2920 = vst.msk [vmem:[%s4381_s7 + $0xe] sm:$0x3] %vm443_vm2, %v3586_v50 }
0x1986   :  { %2864 = vsyncpa [#allocation3], 1 }
0x1987   :  { %2865 = vsyncpa [#allocation5], 1 }

</bundles_post_ra>
